<compile_context>
chip_gen: v6e
topology: v6e:2x2x1
jax: 0.10.0
libtpu: 0.0.40
codegen_flags: <defaults>
</compile_context>

<pallas_src>
import numpy as np
import jax
import jax.numpy as jnp
from jax.experimental import pallas as pl
from jax.experimental.pallas import tpu as pltpu


def _rffn_kernel(x_ref, w1t_ref, b_ref, w2t_ref, o_ref):
    # x:   (TB, in_dim)        batch tile
    # w1t: (in_dim, nfeat)     coeff.T   (resident)
    # b:   (1, nfeat)          offset    (resident, broadcasts over batch)
    # w2t: (nfeat, out_dim)    W2.T      (resident)
    x = x_ref[...]
    w1t = w1t_ref[...]
    in_dim = x.shape[1]

    # K = in_dim contraction on the VPU (in_dim is tiny & static: 2).
    h = x[:, 0:1] * w1t[0:1, :]                        # (TB, nfeat)
    for k in range(1, in_dim):
        h = h + x[:, k:k + 1] * w1t[k:k + 1, :]

    # Fused bias add + EUP cosine (operands never leave vregs).
    h = jnp.cos(h + b_ref[...])

    # K = nfeat contraction on the MXU (it is idle otherwise).
    y = jnp.dot(h, w2t_ref[...], preferred_element_type=jnp.float32)
    # TODO(synk): with out_dim=2 the store is lane-masked; a lane-dense
    # (out_dim, B) layout only pays off once batch is large.
    o_ref[...] = y.astype(o_ref.dtype)


def make_rffn_forward(coeff, offset, w2, *, batch_tile=512):
    """Build a jitted RFFN forward.

    coeff: (nfeat, in_dim), offset: (1, nfeat), w2: (out_dim, nfeat).
    The weight transposes happen ONCE here (init time), never per call.
    """
    w1t = jnp.asarray(coeff, jnp.float32).T                  # (in_dim, nfeat)
    b = jnp.asarray(offset, jnp.float32).reshape(1, -1)      # (1, nfeat)
    w2t = jnp.asarray(w2, jnp.float32).T                     # (nfeat, out_dim)
    in_dim, nfeat = w1t.shape
    out_dim = w2t.shape[1]

    @jax.jit
    def forward(x):
        x = jnp.asarray(x, jnp.float32)
        batch = x.shape[0]

        if batch <= batch_tile:
            tb, padded = batch, batch              # single full block
        else:
            tb = batch_tile                        # multiple of 8 by choice
            padded = ((batch + tb - 1) // tb) * tb
        if padded != batch:
            x = jnp.pad(x, ((0, padded - batch), (0, 0)))

        grid = (padded // tb,)
        flops = 2 * padded * nfeat * (in_dim + out_dim)
        bytes_accessed = 4 * (padded * in_dim + in_dim * nfeat + nfeat
                              + nfeat * out_dim + padded * out_dim)

        out = pl.pallas_call(
            _rffn_kernel,
            out_shape=jax.ShapeDtypeStruct((padded, out_dim), jnp.float32),
            grid=grid,
            in_specs=[
                pl.BlockSpec((tb, in_dim), lambda i: (i, 0)),     # x tile
                pl.BlockSpec((in_dim, nfeat), lambda i: (0, 0)),  # coeff.T resident
                pl.BlockSpec((1, nfeat), lambda i: (0, 0)),       # offset resident
                pl.BlockSpec((nfeat, out_dim), lambda i: (0, 0)), # W2.T resident
            ],
            out_specs=pl.BlockSpec((tb, out_dim), lambda i: (i, 0)),
            compiler_params=pltpu.CompilerParams(
                dimension_semantics=("parallel",)),
            cost_estimate=pl.CostEstimate(
                flops=flops,
                transcendentals=padded * nfeat,
                bytes_accessed=bytes_accessed),
        )(x, w1t, b, w2t)

        return out[:batch] if padded != batch else out

    return forward


def rffn_reference(x, coeff, offset, w2):
    h = jnp.cos(x @ coeff.T + offset)
    return h @ w2.T


if __name__ == "__main__":
    # Small shapes consistent with the module's forward (2-D in / 2-D out).
    batch, in_dim, nfeat, out_dim = 256, 2, 128, 2
    sigma = 10.0

    key = jax.random.PRNGKey(0)
    k_x, k_coeff, k_off, k_w2 = jax.random.split(key, 4)

    # Deterministic synthetic parameters mirroring RFFN.__init__:
    #   coeff  = N(0,1,(nfeat,in_dim)) / sigma
    #   offset = 2*pi * U(0,1,(1,nfeat))
    #   W2     = nn.Linear(nfeat, out_dim, bias=False) default uniform init
    coeff = jax.random.normal(k_coeff, (nfeat, in_dim), dtype=jnp.float32) / sigma
    offset = 2.0 * np.pi * jax.random.uniform(k_off, (1, nfeat), dtype=jnp.float32)
    bound = 1.0 / np.sqrt(nfeat)
    w2 = jax.random.uniform(k_w2, (out_dim, nfeat), dtype=jnp.float32,
                            minval=-bound, maxval=bound)

    x = jax.random.normal(k_x, (batch, in_dim), dtype=jnp.float32)

    # batch_tile=128 -> grid=(2,): exercises the pipelined / parallel batch axis
    # even at this small demo size. Default (512) is the production tile.
    rffn = make_rffn_forward(coeff, offset, w2, batch_tile=128)

    out = jax.block_until_ready(rffn(x))

    ref = rffn_reference(x, coeff, offset, w2)
    np.testing.assert_allclose(np.asarray(out), np.asarray(ref),
                               rtol=1e-5, atol=1e-5)

    print("KERNEL_OK")
</pallas_src>

<mosaic_0001>
module attributes {stable_mosaic.version = 11 : i64} {
  func.func @_rffn_kernel(%arg0: i32, %arg1: memref<128x2xf32, #tpu.memory_space<vmem>>, %arg2: memref<2x128xf32, #tpu.memory_space<vmem>>, %arg3: memref<1x128xf32, #tpu.memory_space<vmem>>, %arg4: memref<128x2xf32, #tpu.memory_space<vmem>>, %arg5: memref<128x2xf32, #tpu.memory_space<vmem>>) attributes {dimension_semantics = [#tpu.dimension_semantics<parallel>], iteration_bounds = array<i64: 2>, scalar_prefetch = 0 : i64, scratch_operands = 0 : i64, tpu.core_type = #tpu.core_type<tc>, window_params = [{transform_indices = @transform_0, window_bounds = array<i64: 128, 2>}, {pipeline_mode = #tpu.pipeline_mode<synchronous>, transform_indices = @transform_1, window_bounds = array<i64: 2, 128>}, {pipeline_mode = #tpu.pipeline_mode<synchronous>, transform_indices = @transform_2, window_bounds = array<i64: 1, 128>}, {pipeline_mode = #tpu.pipeline_mode<synchronous>, transform_indices = @transform_3, window_bounds = array<i64: 128, 2>}, {transform_indices = @transform_4, window_bounds = array<i64: 128, 2>}]} {
    %c0 = arith.constant 0 : index
    %c0_0 = arith.constant 0 : index
    %0 = vector.load %arg1[%c0, %c0_0] : memref<128x2xf32, #tpu.memory_space<vmem>>, vector<128x2xf32>
    %c0_1 = arith.constant 0 : index
    %c0_2 = arith.constant 0 : index
    %1 = vector.load %arg2[%c0_1, %c0_2] : memref<2x128xf32, #tpu.memory_space<vmem>>, vector<2x128xf32>
    %2 = vector.extract_strided_slice %0 {offsets = [0, 0], sizes = [128, 1], strides = [1, 1]} : vector<128x2xf32> to vector<128x1xf32>
    %3 = vector.extract_strided_slice %1 {offsets = [0, 0], sizes = [1, 128], strides = [1, 1]} : vector<2x128xf32> to vector<1x128xf32>
    %4 = vector.broadcast %2 : vector<128x1xf32> to vector<128x128xf32>
    %5 = vector.broadcast %3 : vector<1x128xf32> to vector<128x128xf32>
    %6 = arith.mulf %4, %5 : vector<128x128xf32>
    %7 = vector.extract_strided_slice %0 {offsets = [0, 1], sizes = [128, 1], strides = [1, 1]} : vector<128x2xf32> to vector<128x1xf32>
    %8 = vector.extract_strided_slice %1 {offsets = [1, 0], sizes = [1, 128], strides = [1, 1]} : vector<2x128xf32> to vector<1x128xf32>
    %9 = vector.broadcast %7 : vector<128x1xf32> to vector<128x128xf32>
    %10 = vector.broadcast %8 : vector<1x128xf32> to vector<128x128xf32>
    %11 = arith.mulf %9, %10 : vector<128x128xf32>
    %12 = arith.addf %6, %11 : vector<128x128xf32>
    %c0_3 = arith.constant 0 : index
    %c0_4 = arith.constant 0 : index
    %13 = vector.load %arg3[%c0_3, %c0_4] : memref<1x128xf32, #tpu.memory_space<vmem>>, vector<1x128xf32>
    %14 = vector.broadcast %13 : vector<1x128xf32> to vector<128x128xf32>
    %15 = arith.addf %12, %14 : vector<128x128xf32>
    %16 = math.cos %15 : vector<128x128xf32>
    %c0_5 = arith.constant 0 : index
    %c0_6 = arith.constant 0 : index
    %17 = vector.load %arg4[%c0_5, %c0_6] : memref<128x2xf32, #tpu.memory_space<vmem>>, vector<128x2xf32>
    %cst = arith.constant dense<0.000000e+00> : vector<128x2xf32>
    %18 = tpu.matmul %16, %17, %cst {dimension_numbers = #tpu.dot_dimension_numbers<[1], [0], [0], [1], [0, 0, 1, 1], [], []>} : vector<128x128xf32>, vector<128x2xf32>, vector<128x2xf32> -> vector<128x2xf32>
    %c0_7 = arith.constant 0 : index
    %c0_8 = arith.constant 0 : index
    %19 = vector.load %arg5[%c0_7, %c0_8] : memref<128x2xf32, #tpu.memory_space<vmem>>, vector<128x2xf32>
    tpu.vector_store %arg5[%c0_7, %c0_8], %18 {strides = array<i32>} : memref<128x2xf32, #tpu.memory_space<vmem>>, vector<128x2xf32>,
    return
  }
  func.func @transform_0(%arg0: i32) -> (i32, i32) {
    %c0_i32 = arith.constant 0 : i32
    %c0_i32_0 = arith.constant 0 : i32
    return %arg0, %c0_i32 : i32, i32
  }
  func.func @transform_1(%arg0: i32) -> (i32, i32) {
    %c0_i32 = arith.constant 0 : i32
    %c0_i32_0 = arith.constant 0 : i32
    %c0_i32_1 = arith.constant 0 : i32
    return %c0_i32, %c0_i32_0 : i32, i32
  }
  func.func @transform_2(%arg0: i32) -> (i32, i32) {
    %c0_i32 = arith.constant 0 : i32
    %c0_i32_0 = arith.constant 0 : i32
    %c0_i32_1 = arith.constant 0 : i32
    return %c0_i32, %c0_i32_0 : i32, i32
  }
  func.func @transform_3(%arg0: i32) -> (i32, i32) {
    %c0_i32 = arith.constant 0 : i32
    %c0_i32_0 = arith.constant 0 : i32
    %c0_i32_1 = arith.constant 0 : i32
    return %c0_i32, %c0_i32_0 : i32, i32
  }
  func.func @transform_4(%arg0: i32) -> (i32, i32) {
    %c0_i32 = arith.constant 0 : i32
    %c0_i32_0 = arith.constant 0 : i32
    return %arg0, %c0_i32 : i32, i32
  }
}

</mosaic_0001>

<bundles_post_ra>
// kernel: forward.1
= control target key start
LH: loop header
LB: loop body
LE: loop exit
PB: predicated region body
PF: predicated region fallthrough
CT: control target
= control target key end

     0   :  { %s2722_s15 = smov 0   ;;  %s4867_s0 = inlined_call_operand.vmem [shape: f32[256,2], index: 0, kind: input, shape index: {}]   ;;  %s4868_s1 = inlined_call_operand.vmem [shape: f32[2,128], index: 1, kind: input, shape index: {}]   ;;  %s4869_s2 = inlined_call_operand.vmem [shape: f32[1,128], index: 2, kind: input, shape index: {}]   ;;  %s4870_s3 = inlined_call_operand.vmem [shape: f32[128,2], index: 3, kind: input, shape index: {}]   ;;  %s4871_s4 = inlined_call_operand.vmem [shape: f32[256,2], index: 4, kind: output, shape index: {}]  }
   0x1 LB: > { %s2323_s16 = sadd.s32 4294967295, %s2687_s15   ;;  %p2327_p0 = scmp.ge.s32.totalorder %s2687_s15, 1  ;;  %s2687_s15 = sphi %s2722_s15, %s14_s15  }
   0x2   : > { %p163_p1 = scmp.lt.s32.totalorder %s2687_s15, 3 }
   0x4   : > { %p164_p2 = pnand %p2327_p0, %p163_p1 }
   0x6   : > { %167 = sbr.rel (%p164_p2) target bundleno = 792 (0x318), region = 36 }
   0xb   : > { %s2328_s17 = sshll.u32 %s2323_s16, 4  ;;  %v2689_v0 = vmov 1   ;;  %v2690_v1 = vmov 0   ;;  %v2104_v17 = vld [vmem:[%s4870_s3 + $0x78] sm:$0xff]  ;;  %v2103_v18 = vld [vmem:[%s4870_s3 + $0x70] sm:$0xff]  ;;  %v2102_v19 = vld [vmem:[%s4870_s3 + $0x68] sm:$0xff]  ;;  %v298_v30 = vlaneseq }
   0xc   : > { %2600 = vset.pattern.permute.xlu1 %v2689_v0  ;;  %2599 = vset.pattern.permute.xlu0 %v2690_v1  ;;  %p190_p3 = scmp.lt.s32.totalorder %s2328_s17, 31  ;;  %v2101_v20 = vld [vmem:[%s4870_s3 + $0x60] sm:$0xff]  ;;  %v2100_v21 = vld [vmem:[%s4870_s3 + $0x58] sm:$0xff]  ;;  %v2099_v23 = vld [vmem:[%s4870_s3 + $0x50] sm:$0xff] }
   0xd   : > { %2487 = vmatprep.subr.mxu1 %v2104_v17  ;;  %2431 = vmatprep.subr.mxu0 %v2104_v17  ;;  %v2098_v24 = vld [vmem:[%s4870_s3 + $0x48] sm:$0xff]  ;;  %v2097_v25 = vld [vmem:[%s4870_s3 + $0x40] sm:$0xff]  ;;  %v2096_v26 = vld [vmem:[%s4870_s3 + $0x38] sm:$0xff]  ;;  %v299_v31 = vshrl.u32 %v298_v30, 7 }
   0xe   : > { %s4969_s17 = smov (!%p190_p3, %s2328_s17), 31  ;;  %2503 = vmatpush3.msra.mxu1 %v2104_v17  ;;  %2432 = vmatpush3.msra.mxu0 %v2104_v17  ;;  %v2095_v27 = vld [vmem:[%s4870_s3 + $0x30] sm:$0xff]  ;;  %v2094_v28 = vld [vmem:[%s4870_s3 + $0x28] sm:$0xff]  ;;  %v2093_v29 = vld [vmem:[%s4870_s3 + $0x20] sm:$0xff] }
   0xf   : > { %s2329_s18 = sshll.u32 %s4969_s17, 3  ;;  %2488 = vmatprep.subr.mxu1 %v2103_v18  ;;  %2433 = vmatprep.subr.mxu0 %v2103_v18  ;;  %v384_v32 = vsub.s32 1, %v299_v31  ;;  %v300_v33 = vsub.s32 0, %v299_v31  ;;  %v217_v34 = vld [vmem:[%s4868_s1] sm:$0x3]  ;;  %v2090_v17 = vld [vmem:[%s4870_s3 + $0x8] sm:$0xff] }
  0x10   : > { %s2740_s21 = scalar_lea.vmem %s4867_s0, %s2329_s18  ;;  %2504 = vmatpush3.msra.mxu1 %v2103_v18  ;;  %2434 = vmatpush3.msra.mxu0 %v2103_v18  ;;  %v2821_v41 = vld [vmem:[%s4869_s2] ss:$0 sm:$0xff]  ;;  %s4785_s13 = scalar_lea.vmem %s4871_s4, %s2329_s18 }
  0x11   : > { %v201_v2 = vld [vmem:[%s2740_s21] sm:$0xff]  ;;  %v202_v4 = vld [vmem:[%s2740_s21 + $0x8] sm:$0xff]  ;;  %v211_v6 = vld [vmem:[%s2740_s21 + $0x50] sm:$0xff]  ;;  %2489 = vmatprep.subr.mxu1 %v2102_v19  ;;  %2435 = vmatprep.subr.mxu0 %v2102_v19  ;;  %v2812_v35 = vrot.slane %v217_v34, %v384_v32  ;;  %v2814_v36 = vrot.slane %v217_v34, %v300_v33 }
  0x12   : > { %319 = vperm.xlu1 %2600, %v201_v2   ;;  %220 = vperm.xlu0 %2599, %v201_v2   ;;  %v209_v3 = vld [vmem:[%s2740_s21 + $0x40] sm:$0xff]  ;;  %v210_v5 = vld [vmem:[%s2740_s21 + $0x48] sm:$0xff]  ;;  %v204_v7 = vld [vmem:[%s2740_s21 + $0x18] sm:$0xff] }
  0x13   : > { %v203_v8 = vld [vmem:[%s2740_s21 + $0x10] sm:$0xff]  ;;  %v213_v9 = vld [vmem:[%s2740_s21 + $0x60] sm:$0xff]  ;;  %v206_v10 = vld [vmem:[%s2740_s21 + $0x28] sm:$0xff]  ;;  %2505 = vmatpush3.msra.mxu1 %v2102_v19  ;;  %2436 = vmatpush3.msra.mxu0 %v2102_v19 }
  0x14   : > { %v215_v11 = vld [vmem:[%s2740_s21 + $0x70] sm:$0xff]  ;;  %v208_v12 = vld [vmem:[%s2740_s21 + $0x38] sm:$0xff]  ;;  %v205_v14 = vld [vmem:[%s2740_s21 + $0x20] sm:$0xff]  ;;  %2490 = vmatprep.subr.mxu1 %v2101_v20  ;;  %2437 = vmatprep.subr.mxu0 %v2101_v20 }
  0x15   : > { %v212_v13 = vld [vmem:[%s2740_s21 + $0x58] sm:$0xff]  ;;  %v214_v15 = vld [vmem:[%s2740_s21 + $0x68] sm:$0xff]  ;;  %v207_v16 = vld [vmem:[%s2740_s21 + $0x30] sm:$0xff]  ;;  %2506 = vmatpush3.msra.mxu1 %v2101_v20  ;;  %2438 = vmatpush3.msra.mxu0 %v2101_v20 }
  0x16   : > { %351 = vperm.xlu1 %2600, %v209_v3   ;;  %260 = vperm.xlu0 %2599, %v209_v3   ;;  %v216_v22 = vld [vmem:[%s2740_s21 + $0x78] sm:$0xff]  ;;  %v2091_v3 = vld [vmem:[%s4870_s3 + $0x10] sm:$0xff] }
  0x17   : > { %2491 = vmatprep.subr.mxu1 %v2100_v21  ;;  %2439 = vmatprep.subr.mxu0 %v2100_v21  ;;  %v2092_v2 = vld [vmem:[%s4870_s3 + $0x18] sm:$0xff] }
  0x18   : > { %2507 = vmatpush3.msra.mxu1 %v2100_v21  ;;  %2440 = vmatpush3.msra.mxu0 %v2100_v21 }
  0x19   : > { %2492 = vmatprep.subr.mxu1 %v2099_v23  ;;  %2441 = vmatprep.subr.mxu0 %v2099_v23 }
  0x1a   : > { %2601 = vset.pattern.permute.xlu1 %v2690_v1  ;;  %225 = vperm.xlu0 %2599, %v202_v4  }
  0x1b   : > { %265 = vperm.xlu1 %2601, %v210_v5   ;;  %2508 = vmatpush3.msra.mxu1 %v2099_v23 }
  0x1c   : > { %2493 = vmatprep.subr.mxu1 %v2098_v24  ;;  %2442 = vmatpush3.msra.mxu0 %v2099_v23 }
  0x1d   : > { %2509 = vmatpush3.msra.mxu1 %v2098_v24  ;;  %2443 = vmatprep.subr.mxu0 %v2098_v24 }
  0x1e   : > { %270 = vperm.xlu0 %2599, %v211_v6   ;;  %2494 = vmatprep.subr.mxu1 %v2097_v25 }
  0x1f   : > { %2602 = vset.pattern.permute.xlu1 %v2689_v0  ;;  %2510 = vmatpush3.msra.mxu1 %v2097_v25 }
  0x20   : > { %355 = vperm.xlu1 %2602, %v210_v5   ;;  %2495 = vmatprep.subr.mxu1 %v2096_v26 }
  0x21   : > { %2511 = vmatpush3.msra.mxu1 %v2096_v26  ;;  %2444 = vmatpush3.msra.mxu0 %v2098_v24 }
  0x22   : > { %235 = vperm.xlu0 %2599, %v204_v7   ;;  %2496 = vmatprep.subr.mxu1 %v2095_v27 }
  0x23   : > { %2512 = vmatpush3.msra.mxu1 %v2095_v27  ;;  %2445 = vmatprep.subr.mxu0 %v2097_v25 }
  0x24   : > { %2603 = vset.pattern.permute.xlu1 %v2690_v1  ;;  %2446 = vmatpush3.msra.mxu0 %v2097_v25  ;;  %v2089_v25 = vld [vmem:[%s4870_s3] sm:$0xff] }
  0x25   : > { %230 = vperm.xlu1 %2603, %v203_v8   ;;  %2447 = vmatprep.subr.mxu0 %v2096_v26 }
  0x26   : > { %280 = vperm.xlu0 %2599, %v213_v9   ;;  %2448 = vmatpush3.msra.mxu0 %v2096_v26 }
  0x27   : > { %2449 = vmatprep.subr.mxu0 %v2095_v27  ;;  %2497 = vmatprep.subr.mxu1 %v2094_v28 }
  0x28   : > { %2450 = vmatpush3.msra.mxu0 %v2095_v27  ;;  %2513 = vmatpush3.msra.mxu1 %v2094_v28 }
  0x29   : > { %2604 = vset.pattern.permute.xlu1 %v2689_v0  ;;  %2451 = vmatprep.subr.mxu0 %v2094_v28 }
  0x2a   : > { %327 = vperm.xlu1 %2604, %v203_v8   ;;  %245 = vperm.xlu0 %2599, %v206_v10   ;;  %v4875_v8 = vmov 2131351028  }
  0x2b   : > { %2452 = vmatpush3.msra.mxu0 %v2094_v28  ;;  %2498 = vmatprep.subr.mxu1 %v2093_v29  ;;  %v4890_v28 = vmov 1326507024  }
  0x2c   : > { %2453 = vmatprep.subr.mxu0 %v2093_v29  ;;  %2514 = vmatpush3.msra.mxu1 %v2093_v29 }
  0x2d   : > { %2454 = vmatpush3.msra.mxu0 %v2093_v29  ;;  %2499 = vmatprep.subr.mxu1 %v2092_v2 }
  0x2e   : > { %359 = vperm.xlu1 %2604, %v211_v6   ;;  %290 = vperm.xlu0 %2599, %v215_v11   ;;  %v4877_v6 = vmov 2475754826  }
  0x2f   : > { %2515 = vmatpush3.msra.mxu1 %v2092_v2  ;;  %2455 = vmatprep.subr.mxu0 %v2092_v2 }
  0x30   : > { %2500 = vmatprep.subr.mxu1 %v2091_v3  ;;  %2456 = vmatpush3.msra.mxu0 %v2092_v2 }
  0x31   : > { %2516 = vmatpush3.msra.mxu1 %v2091_v3  ;;  %2457 = vmatprep.subr.mxu0 %v2091_v3 }
  0x32   : > { %2605 = vset.pattern.permute.xlu1 %v2690_v1  ;;  %255 = vperm.xlu0 %2599, %v208_v12  }
  0x33   : > { %275 = vperm.xlu1 %2605, %v212_v13   ;;  %2501 = vmatprep.subr.mxu1 %v2090_v17 }
  0x34   : > { %2517 = vmatpush3.msra.mxu1 %v2090_v17  ;;  %2458 = vmatpush3.msra.mxu0 %v2091_v3 }
  0x35   : > { %2502 = vmatprep.subr.mxu1 %v2089_v25  ;;  %2459 = vmatprep.subr.mxu0 %v2090_v17 }
  0x36   : > { %2613 = vset.pattern.permute.xlu0 %v2689_v0  ;;  %2518 = vmatpush3.msra.mxu1 %v2089_v25 }
  0x37   : > { %2606 = vset.pattern.permute.xlu1 %v2689_v0  ;;  %323 = vperm.xlu0 %2613, %v202_v4   ;;  %v4873_v4 = vmov 683565275  }
  0x38   : > { %363 = vperm.xlu1 %2606, %v212_v13   ;;  %2460 = vmatpush3.msra.mxu0 %v2090_v17 }
  0x39   : > { %2461 = vmatprep.subr.mxu0 %v2089_v25 }
  0x3a   : > { %2462 = vmatpush3.msra.mxu0 %v2089_v25 }
  0x3b   : > { %331 = vperm.xlu0 %2613, %v204_v7  }
  0x3c   : > { %2607 = vset.pattern.permute.xlu1 %v2690_v1 }
  0x3d   : > { %240 = vperm.xlu1 %2607, %v205_v14  }
  0x3f   : > { %339 = vperm.xlu0 %2613, %v206_v10   ;;  %v4879_v10 = vmov 2102212464  }
  0x41   : > { %2608 = vset.pattern.permute.xlu1 %v2689_v0 }
  0x42   : > { %335 = vperm.xlu1 %2608, %v205_v14  }
  0x43   : > { %347 = vperm.xlu0 %2613, %v208_v12  }
  0x46   : > { %367 = vperm.xlu1 %2608, %v213_v9  }
  0x4a   : > { %2609 = vset.pattern.permute.xlu1 %v2690_v1 }
  0x4b   : > { %285 = vperm.xlu1 %2609, %v214_v15  }
  0x4f   : > { %2610 = vset.pattern.permute.xlu1 %v2689_v0 }
  0x50   : > { %371 = vperm.xlu1 %2610, %v214_v15   ;;  %v4894_v15 = vmov 920167782  }
  0x54   : > { %2611 = vset.pattern.permute.xlu1 %v2690_v1 }
  0x55   : > { %250 = vperm.xlu1 %2611, %v207_v16  }
  0x59   : > { %2612 = vset.pattern.permute.xlu1 %v2689_v0 }
  0x5a   : > { %343 = vperm.xlu1 %2612, %v207_v16  }
  0x5e   : > { %375 = vperm.xlu1 %2612, %v215_v11  }
  0x62   : > { %2614 = vset.pattern.permute.xlu1 %v2690_v1 }
  0x63   : > { %295 = vperm.xlu1 %2614, %v216_v22  }
  0x67   : > { %2615 = vset.pattern.permute.xlu1 %v2689_v0 }
  0x68   : > { %379 = vperm.xlu1 %2615, %v216_v22  }
  0x8d   : > { %v320_v37 = vpop.permute.xlu1 %319  ;;  %v221_v38 = vpop.permute.xlu0 %220 }
  0x8e   : > { %v386_v39 = vmul.f32 %v2812_v35, %v320_v37  ;;  %v302_v40 = vmul.f32 %v2814_v36, %v221_v38 }
  0x90   : > { %v402_v42 = vadd.f32 %v386_v39, %v302_v40 }
  0x91   : > { %v352_v43 = vpop.permute.xlu1 %351  ;;  %v261_v44 = vpop.permute.xlu0 %260 }
  0x92   : > { %v2824_v45 = vadd.f32 %v2821_v41, %v402_v42  ;;  %v394_v53 = vmul.f32 %v2812_v35, %v352_v43  ;;  %v310_v54 = vmul.f32 %v2814_v36, %v261_v44 }
  0x94   : > { %v444_v46 = vand.u32 2139095040, %v2824_v45  ;;  %v410_v59 = vadd.f32 %v394_v53, %v310_v54  ;;  %v441_v60 = vand.u32 2147483647, %v2824_v45  ;;  %vm443_vm14 = vcmp.lt.s32.totalorder %v2824_v45, 0 }
  0x95   : > { %v2827_v47 = vpop.permute.xlu0 %225 }
  0x96   : > { %v445_v48 = vshrl.u32 %v444_v46, 23  ;;  %v266_v49 = vpop.permute.xlu1 %265  ;;  %v2843_v0 = vadd.f32 %v2821_v41, %v410_v59  ;;  %v448_v1 = vand.u32 8388607, %v441_v60 }
  0x97   : > { %v311_v31 = vmul.f32 %v2814_v36, %v266_v49 }
  0x98   : > { %v2333_v50 = vadd.s32 4294967169, %v445_v48  ;;  %v1268_v30 = vand.u32 2139095040, %v2843_v0  ;;  %v449_v32 = vor.u32 8388608, %v448_v1 }
  0x99   : > { %v2829_v51 = vpop.permute.xlu0 %270 }
  0x9a   : > { %v451_v52 = vadd.s32 1, %v2333_v50  ;;  %v1269_v42 = vshrl.u32 %v1268_v30, 23  ;;  %v489_v46 = vshll.u32 %v449_v32, 8  ;;  %v312_v53 = vmul.f32 %v2814_v36, %v2829_v51 }
  0x9b   : > { %v356_v55 = vpop.permute.xlu1 %355 }
  0x9c   : > { %vm452_vm0 = vcmp.gt.s32.totalorder %v451_v52, 0  ;;  %v395_v18 = vmul.f32 %v2812_v35, %v356_v55 }
  0x9d   : > { %v453_v56 = vsel %vm452_vm0, %v451_v52, 0  ;;  %v2833_v57 = vpop.permute.xlu0 %235  ;;  %vm3072_vm0 = vcmp.le.f32.partialorder %v441_v60, 0.7853982 }
  0x9e   : > { %v455_v58 = vand.u32 31, %v453_v56  ;;  %v2860_v12 = vshrl.u32 %v453_v56, 5  ;;  %v411_v38 = vadd.f32 %v395_v18, %v311_v31 }
  0xa0   : > { %v2836_v61 = vsub.s32 32, %v455_v58  ;;  %v2838_v62 = vpop.permute.xlu1 %230  ;;  %v458_v5 = vshll.u32 %v4873_v4, %v455_v58  ;;  %v461_v13 = vshll.u32 %v4877_v6, %v455_v58  ;;  %v467_v14 = vshll.u32 %v4879_v10, %v455_v58 }
  0xa1   : > { %v2840_v63 = vpop.permute.xlu0 %280  ;;  %v464_v20 = vshll.u32 %v4875_v8, %v455_v58  ;;  %v470_v27 = vshll.u32 %v4894_v15, %v455_v58  ;;  %vm476_vm1 = vcmp.lt.s32.totalorder %v2860_v12, 4  ;;  %vm473_vm2 = vcmp.lt.s32.totalorder %v2860_v12, 1 }
  0xa2   : > { %v459_v7 = vshrl.u32 %v4877_v6, %v2836_v61  ;;  %v462_v9 = vshrl.u32 %v4875_v8, %v2836_v61  ;;  %v465_v11 = vshrl.u32 %v4879_v10, %v2836_v61  ;;  %v468_v16 = vshrl.u32 %v4894_v15, %v2836_v61 }
  0xa3   : > { %v471_v29 = vshrl.u32 %v4890_v28, %v2836_v61  ;;  %vm475_vm3 = vcmp.lt.s32.totalorder %v2860_v12, 3  ;;  %vm474_vm4 = vcmp.lt.s32.totalorder %v2860_v12, 2  ;;  %v2905_v54 = vadd.f32 %v2821_v41, %v411_v38 }
  0xa4   : > { %v460_v22 = vor.u32 %v459_v7, %v458_v5  ;;  %v463_v23 = vor.u32 %v462_v9, %v461_v13  ;;  %v469_v24 = vor.u32 %v468_v16, %v467_v14  ;;  %v466_v26 = vor.u32 %v465_v11, %v464_v20 }
  0xa5   : > { %v2870_v19 = vpop.permute.xlu0 %245  ;;  %v328_v21 = vpop.permute.xlu1 %327  ;;  %v472_v34 = vor.u32 %v471_v29, %v470_v27  ;;  %v304_v55 = vmul.f32 %v2814_v36, %v2838_v62  ;;  %v457_v56 = vshrl.u32 %v4873_v4, %v2836_v61  ;;  %v1371_v11 = vand.u32 2139095040, %v2905_v54 }
  0xa6   : > { %v482_v37 = vsel %vm476_vm1, %v469_v24, 920167782  ;;  %v481_v39 = vsel %vm473_vm2, %v460_v22, %v463_v23  ;;  %v388_v43 = vmul.f32 %v2812_v35, %v328_v21  ;;  %v478_v48 = vsel %vm476_vm1, %v466_v26, 2102212464 }
  0xa7   : > { %v483_v40 = vsel %vm475_vm3, %v466_v26, %v482_v37  ;;  %v485_v50 = vsel %vm473_vm2, %v463_v23, %v466_v26  ;;  %v486_v52 = vsel %vm476_vm1, %v472_v34, 1326507024  ;;  %v477_v5 = vsel %vm473_vm2, %v457_v56, %v460_v22 }
  0xa8   : > { %v484_v49 = vsel %vm474_vm4, %v481_v39, %v483_v40  ;;  %v487_v1 = vsel %vm475_vm3, %v469_v24, %v486_v52  ;;  %v404_v51 = vadd.f32 %v388_v43, %v304_v55  ;;  %v479_v62 = vsel %vm475_vm3, %v463_v23, %v478_v48 }
  0xa9   : > { %v2882_v33 = vpop.permute.xlu0 %290  ;;  %v360_v44 = vpop.permute.xlu1 %359  ;;  %v2916_v2 = vmul.u32.u64.low %v489_v46, %v484_v49  ;;  %v2917_v3 = vmul.u32.u64.high %v489_v46, %v484_v49, %v2916_v2  ;;  %v488_v61 = vsel %vm474_vm4, %v485_v50, %v487_v1  ;;  %v2365_v13 = vadd.s32 4294967169, %v1269_v42 }
  0xaa   : > { %v396_v58 = vmul.f32 %v2812_v35, %v360_v44  ;;  %v2926_v7 = vmul.u32.u64.low %v489_v46, %v488_v61  ;;  %v2927_v9 = vmul.u32.u64.high %v489_v46, %v488_v61, %v2926_v7  ;;  %v480_v16 = vsel %vm474_vm4, %v477_v5, %v479_v62 }
  0xab   : > { %v499_v17 = vadd.s32 1, %v2917_v3  ;;  %v2934_v18 = vadd.f32 %v2821_v41, %v404_v51  ;;  %v1372_v22 = vshrl.u32 %v1371_v11, 23  ;;  %v496_v23 = vmul.u32 %v489_v46, %v480_v16 }
  0xac   : > { %v412_v14 = vadd.f32 %v396_v58, %v312_v53  ;;  %vm498_vm5 = vc.u32 %v2927_v9, %v2916_v2  ;;  %v1275_v24 = vadd.s32 1, %v2365_v13  ;;  %v303_v12 = vmul.f32 %v2814_v36, %v2827_v47 }
  0xad   : > { %v2912_v59 = vpop.permute.xlu0 %255  ;;  %v500_v26 = vsel %vm498_vm5, %v499_v17, %v2917_v3  ;;  %v650_v27 = vand.u32 2139095040, %v2934_v18  ;;  %v2369_v31 = vadd.s32 4294967169, %v1372_v22  ;;  %v4872_v37 = vand.u32 2147483647, %v2843_v0 }
  0xae   : > { %v276_v20 = vpop.permute.xlu1 %275  ;;  %v2939_v25 = vadd.f32 %v2821_v41, %v412_v14  ;;  %v501_v30 = vadd.s32 %v500_v26, %v496_v23  ;;  %vm1276_vm6 = vcmp.gt.s32.totalorder %v1275_v24, 0  ;;  %v305_v1 = vmul.f32 %v2814_v36, %v2833_v57 }
  0xaf   : > { %v651_v39 = vshrl.u32 %v650_v27, 23  ;;  %v1277_v44 = vsel %vm1276_vm6, %v1275_v24, 0  ;;  %v1378_v46 = vadd.s32 1, %v2369_v31  ;;  %v1272_v48 = vand.u32 8388607, %v4872_v37 }
  0xb0   : > { %v502_v34 = vadd.s32 536870912, %v501_v30  ;;  %v1474_v38 = vand.u32 2139095040, %v2939_v25  ;;  %v313_v50 = vmul.f32 %v2814_v36, %v276_v20  ;;  %v2959_v58 = vand.u32 31, %v1277_v44 }
  0xb1   : > { %v2341_v53 = vadd.s32 4294967169, %v651_v39  ;;  %vm1379_vm7 = vcmp.gt.s32.totalorder %v1378_v46, 0  ;;  %v1273_v51 = vor.u32 8388608, %v1272_v48  ;;  %v2972_v57 = vshrl.u32 %v1277_v44, 5 }
  0xb2   : > { %v324_v21 = vpop.permute.xlu0 %323  ;;  %v2948_v43 = vshrl.u32 %v502_v34, 30  ;;  %v1475_v49 = vshrl.u32 %v1474_v38, 23  ;;  %v2967_v16 = vsub.s32 32, %v2959_v58  ;;  %v1380_v17 = vsel %vm1379_vm7, %v1378_v46, 0 }
  0xb3   : > { %v387_v29 = vmul.f32 %v2812_v35, %v324_v21  ;;  %v364_v32 = vpop.permute.xlu1 %363  ;;  %v657_v7 = vadd.s32 1, %v2341_v53  ;;  %v2976_v21 = vmul.f32 %v2814_v36, %v2840_v63  ;;  %v2978_v22 = vshll.u32 %v1273_v51, 8 }
  0xb4   : > { %v397_v47 = vmul.f32 %v2812_v35, %v364_v32  ;;  %v504_v56 = vshll.u32 %v2948_v43, 30  ;;  %v2373_v5 = vadd.s32 4294967169, %v1475_v49  ;;  %v307_v23 = vmul.f32 %v2814_v36, %v2870_v19 }
  0xb5   : > { %v403_v40 = vadd.f32 %v387_v29, %v303_v12  ;;  %v2986_v27 = vand.u32 31, %v1380_v17  ;;  %vm658_vm8 = vcmp.gt.s32.totalorder %v657_v7, 0  ;;  %v2989_v31 = vshrl.u32 %v1380_v17, 5 }
  0xb6   : > { %v332_v42 = vpop.permute.xlu0 %331  ;;  %v413_v3 = vadd.f32 %v397_v47, %v313_v50  ;;  %v2964_v14 = vsub.s32 %v501_v30, %v504_v56  ;;  %v1481_v24 = vadd.s32 1, %v2373_v5  ;;  %v2993_v63 = vmul.f32 %v2814_v36, %v2882_v33 }
  0xb7   : > { %v389_v52 = vmul.f32 %v2812_v35, %v332_v42  ;;  %v2956_v55 = vadd.f32 %v2821_v41, %v403_v40  ;;  %v1283_v34 = vshrl.u32 %v4877_v6, %v2967_v16  ;;  %v3001_v39 = vshrl.u32 %v4873_v4, %v2967_v16 }
  0xb8   : > { %v241_v61 = vpop.permute.xlu1 %240  ;;  %v2970_v20 = vadd.f32 %v2821_v41, %v413_v3  ;;  %v507_v30 = vsub.s32 0, %v2964_v14  ;;  %v1282_v40 = vshll.u32 %v4873_v4, %v2959_v58  ;;  %v1286_v42 = vshrl.u32 %v4875_v8, %v2967_v16 }
  0xb9   : > { %v405_v62 = vadd.f32 %v389_v52, %v305_v1  ;;  %v547_v11 = vand.u32 2139095040, %v2956_v55  ;;  %v659_v33 = vsel %vm658_vm8, %v657_v7, 0  ;;  %vm1482_vm9 = vcmp.gt.s32.totalorder %v1481_v24, 0 }
  0xba   : > { %v340_v13 = vpop.permute.xlu0 %339  ;;  %v1577_v19 = vand.u32 2139095040, %v2970_v20  ;;  %v2334_v38 = vmin.u32 %v507_v30, %v2964_v14  ;;  %v3009_v46 = vsub.s32 32, %v2986_v27  ;;  %v309_v48 = vmul.f32 %v2814_v36, %v2912_v59 }
  0xbb   : > { %v2983_v26 = vadd.f32 %v2821_v41, %v405_v62  ;;  %v391_v12 = vmul.f32 %v2812_v35, %v340_v13  ;;  %v548_v29 = vshrl.u32 %v547_v11, 23  ;;  %v3014_v56 = vor.u32 %v1283_v34, %v1282_v40 }
  0xbc   : > { %v1578_v52 = vshrl.u32 %v1577_v19, 23  ;;  %v509_v53 = vclz %v2334_v38  ;;  %v1285_v1 = vshll.u32 %v4877_v6, %v2959_v58  ;;  %v3018_v3 = vand.u32 31, %v659_v33 }
  0xbd   : > { %4906 = vst [vmem:[#allocation2_spill] sm:$0xff] %v2983_v26  ;;  %v336_v32 = vpop.permute.xlu1 %335  ;;  %v753_v47 = vand.u32 2139095040, %v2983_v26  ;;  %v407_v44 = vadd.f32 %v391_v12, %v307_v23  ;;  %v2337_v49 = vadd.s32 4294967169, %v548_v29  ;;  %v1483_v51 = vsel %vm1482_vm9, %v1481_v24, 0 }
  0xbe   : > { %v390_v50 = vmul.f32 %v2812_v35, %v336_v32  ;;  %v306_v5 = vmul.f32 %v2814_v36, %v241_v61  ;;  %v1288_v62 = vshll.u32 %v4875_v8, %v2959_v58  ;;  %v348_v11 = vpop.permute.xlu0 %347  ;;  %v2335_v13 = vadd.s32 4294967294, %v509_v53 }
  0xbf   : > { %v754_v7 = vshrl.u32 %v753_v47, 23  ;;  %v3024_v59 = vadd.f32 %v2821_v41, %v407_v44  ;;  %v3026_v17 = vor.u32 %v1286_v42, %v1285_v1  ;;  %v3028_v23 = vshrl.u32 %v659_v33, 5 }
  0xc0   : > { %v554_v12 = vadd.s32 1, %v2337_v49  ;;  %v406_v29 = vadd.f32 %v390_v50, %v306_v5  ;;  %v497_v24 = vadd.s32 %v2916_v2, %v2927_v9  ;;  %v3032_v30 = vand.u32 31, %v1483_v51 }
  0xc1   : > { %4907 = vst [vmem:[#allocation3_spill] sm:$0xff] %v3024_v59  ;;  %v2377_v61 = vadd.s32 4294967169, %v1578_v52  ;;  %v1289_v19 = vshrl.u32 %v4879_v10, %v2967_v16  ;;  %v1292_v32 = vshrl.u32 %v4894_v15, %v2967_v16  ;;  %v3039_v34 = vsub.s32 32, %v3018_v3  ;;  %v368_v5 = vpop.permute.xlu1 %367 }
  0xc2   : > { %v3041_v38 = vshrl.u32 %v1483_v51, 5  ;;  %v393_v40 = vmul.f32 %v2812_v35, %v348_v11  ;;  %vm2336_vm10 = vcmp.lt.s32.totalorder %v2335_v13, 0  ;;  %v2345_v42 = vadd.s32 4294967169, %v754_v7 }
  0xc3   : > { %v959_v2 = vand.u32 2139095040, %v3024_v59  ;;  %v512_v9 = vsel %vm2336_vm10, 0, %v2335_v13  ;;  %v1291_v33 = vshll.u32 %v4879_v10, %v2959_v58  ;;  %vm555_vm11 = vcmp.gt.s32.totalorder %v554_v12, 0 }
  0xc4   : > { %v3048_v47 = vadd.f32 %v2821_v41, %v406_v29  ;;  %v513_v44 = vsub.s32 32, %v512_v9  ;;  %v517_v49 = vsub.s32 4294967266, %v512_v9  ;;  %v3051_v50 = vsub.s32 32, %v3032_v30 }
  0xc5   : > { %v1584_v52 = vadd.s32 1, %v2377_v61  ;;  %v1290_v53 = vor.u32 %v1289_v19, %v1288_v62  ;;  %v1293_v1 = vor.u32 %v1292_v32, %v1291_v33  ;;  %v409_v51 = vadd.f32 %v393_v40, %v309_v48 }
  0xc6   : > { %4908 = vst [vmem:[#allocation4_spill] sm:$0xff] %v3048_v47  ;;  %v515_v7 = vshrl.u32 %v497_v24, %v513_v44  ;;  %v518_v11 = vadd.s32 127, %v517_v49  ;;  %v1295_v13 = vshrl.u32 %v4890_v28, %v2967_v16  ;;  %v556_v37 = vsel %vm555_vm11, %v554_v12, 0 }
  0xc7   : > { %v760_v4 = vadd.s32 1, %v2345_v42  ;;  %v960_v8 = vshrl.u32 %v959_v2, 23  ;;  %v514_v29 = vshll.u32 %v2964_v14, %v512_v9  ;;  %v856_v6 = vand.u32 2139095040, %v3048_v47 }
  0xc8   : > { %v519_v10 = vshll.u32 %v518_v11, 23  ;;  %v1294_v61 = vshll.u32 %v4894_v15, %v2959_v58  ;;  %vm1300_vm12 = vcmp.lt.s32.totalorder %v2972_v57, 4  ;;  %v398_v48 = vmul.f32 %v2812_v35, %v368_v5 }
  0xc9   : > { %v516_v62 = vor.u32 %v515_v7, %v514_v29  ;;  %v527_v24 = vsub.s32 4, %v2948_v43  ;;  %v1306_v16 = vsel %vm1300_vm12, %v1293_v1, 920167782  ;;  %v3064_v12 = vand.u32 31, %v556_v37 }
  0xca   : > { %vm1585_vm13 = vcmp.gt.s32.totalorder %v1584_v52, 0  ;;  %v520_v14 = vor.u32 4788187, %v519_v10  ;;  %v1296_v19 = vor.u32 %v1295_v13, %v1294_v61  ;;  %vm761_vm15 = vcmp.gt.s32.totalorder %v760_v4, 0 }
  0xcb   : > { %v3068_v58 = vadd.f32 %v2821_v41, %v409_v51  ;;  %vm1297_vm1 = vcmp.lt.s32.totalorder %v2972_v57, 1  ;;  %vm1299_vm2 = vcmp.lt.s32.totalorder %v2972_v57, 3  ;;  %v2353_v40 = vadd.s32 4294967169, %v960_v8 }
  0xcc   : > { %v857_v42 = vshrl.u32 %v856_v6, 23  ;;  %v1305_v10 = vsel %vm1297_vm1, %v3014_v56, %v3026_v17  ;;  %v1307_v2 = vsel %vm1299_vm2, %v1290_v53, %v1306_v16  ;;  %v414_v9 = vadd.f32 %v398_v48, %v2976_v21 }
  0xcd   : > { %4909 = vst [vmem:[#allocation5_spill] sm:$0xff] %v3068_v58  ;;  %v521_v60 = vand.u32 2147483647, %v520_v14  ;;  %v523_v33 = vcvt.s32.f32 %v516_v62  ;;  %v1309_v44 = vsel %vm1297_vm1, %v3026_v17, %v1290_v53  ;;  %v1586_v49 = vsel %vm1585_vm13, %v1584_v52, 0  ;;  %v286_v62 = vpop.permute.xlu1 %285 }
  0xce   : > { %v762_v8 = vsel %vm761_vm15, %v760_v4, 0  ;;  %vm1298_vm3 = vcmp.lt.s32.totalorder %v2972_v57, 2  ;;  %v1310_v6 = vsel %vm1300_vm12, %v1296_v19, 1326507024  ;;  %v1302_v5 = vsel %vm1300_vm12, %v1290_v53, 2102212464 }
  0xcf   : > { %v524_v51 = vmul.f32 %v523_v33, %v521_v60  ;;  %v1308_v21 = vsel %vm1298_vm3, %v1305_v10, %v1307_v2  ;;  %v1311_v7 = vsel %vm1299_vm2, %v1293_v1, %v1310_v6  ;;  %v966_v11 = vadd.s32 1, %v2353_v40 }
  0xd0   : > { %v2349_v13 = vadd.s32 4294967169, %v857_v42  ;;  %v1165_v52 = vand.u32 2139095040, %v3068_v58  ;;  %v1312_v4 = vsel %vm1298_vm3, %v1309_v44, %v1311_v7  ;;  %v3102_v29 = vadd.f32 %v2821_v41, %v414_v9 }
  0xd1   : > { %v525_v61 = vxor.u32 2147483648, %v524_v51  ;;  %v3105_v48 = vmul.u32.u64.low %v2978_v22, %v1312_v4  ;;  %v3106_v53 = vmul.u32.u64.high %v2978_v22, %v1312_v4, %v3105_v48  ;;  %v1301_v1 = vsel %vm1297_vm1, %v3001_v39, %v3014_v56 }
  0xd2   : > { %4912 = vst [vmem:[#allocation6_spill] sm:$0xff] %v3102_v29  ;;  %v1303_v16 = vsel %vm1299_vm2, %v3026_v17, %v1302_v5  ;;  %v3116_v14 = vmul.u32.u64.low %v2978_v22, %v1308_v21  ;;  %v3117_v19 = vmul.u32.u64.high %v2978_v22, %v1308_v21, %v3116_v14  ;;  %v3120_v40 = vshrl.u32 %v556_v37, 5  ;;  %v372_v5 = vpop.permute.xlu1 %371 }
  0xd3   : > { %v3122_v42 = vand.u32 31, %v1586_v49  ;;  %v526_v10 = vsel %vm443_vm14, %v525_v61, %v524_v51  ;;  %v528_v39 = vsel %vm443_vm14, %v527_v24, %v2948_v43  ;;  %vm967_vm4 = vcmp.gt.s32.totalorder %v966_v11, 0 }
  0xd4   : > { %v863_v56 = vadd.s32 1, %v2349_v13  ;;  %v1166_v2 = vshrl.u32 %v1165_v52, 23  ;;  %v529_v17 = vsel %vm3072_vm0, %v2824_v45, %v526_v10  ;;  %v3132_v9 = vshrl.u32 %v1586_v49, 5 }
  0xd5   : > { %v3134_v37 = vand.u32 31, %v762_v8  ;;  %2616 = vcosq.f32 %v529_v17  ;;  %v1304_v60 = vsel %vm1298_vm3, %v1301_v1, %v1303_v16  ;;  %v3139_v33 = vsub.s32 32, %v3064_v12 }
  0xd6   : > { %4913 = vst [vmem:[#allocation7_spill] sm:$0xff] %v3132_v9  ;;  %v1680_v43 = vand.u32 2139095040, %v3102_v29  ;;  %v530_v24 = vsel %vm3072_vm0, 0, %v528_v39  ;;  %vm1322_vm5 = vc.u32 %v3106_v53, %v3116_v14  ;;  %v3147_v44 = vsub.s32 32, %v3122_v42 }
  0xd7   : > { %4914 = vst [vmem:[#allocation8_spill] sm:$0xff] %v3134_v37  ;;  %v968_v49 = vsel %vm967_vm4, %v966_v11, 0  ;;  %2618 = vsinq.f32 %v529_v17  ;;  %v1323_v6 = vadd.s32 1, %v3117_v19  ;;  %v3150_v57 = vshrl.u32 %v762_v8, 5 }
  0xd8   : > { %vm864_vm6 = vcmp.gt.s32.totalorder %v863_v56, 0  ;;  %v2361_v51 = vadd.s32 4294967169, %v1166_v2  ;;  %v1320_v21 = vmul.u32 %v2978_v22, %v1304_v60  ;;  %v3154_v32 = vsub.s32 32, %v3134_v37 }
  0xd9   : > { %4915 = vst [vmem:[#allocation9_spill] sm:$0xff] %v3150_v57  ;;  %v315_v7 = vmul.f32 %v2814_v36, %v286_v62  ;;  %v3157_v13 = vand.u32 3, %v530_v24  ;;  %v1324_v52 = vsel %vm1322_vm5, %v1323_v6, %v3117_v19  ;;  %v3160_v11 = vshrl.u32 %v968_v49, 5 }
  0xda   : > { %4916 = vst [vmem:[#allocation10_spill] sm:$0xff] %v3154_v32  ;;  %v3162_v4 = vand.u32 31, %v968_v49  ;;  %v1681_v8 = vshrl.u32 %v1680_v43, 23  ;;  %v1325_v61 = vadd.s32 %v1324_v52, %v1320_v21  ;;  %v3164_v48 = vsel %vm864_vm6, %v863_v56, 0 }
  0xdb   : > { %4917 = vst [vmem:[#allocation11_spill] sm:$0xff] %v3160_v11  ;;  %v399_v1 = vmul.f32 %v2812_v35, %v372_v5  ;;  %v4893_v22 = vand.u32 2147483647, %v2905_v54  ;;  %v4918_v16 = vmov 2102212464   ;;  %v3170_v62 = vadd.s32 1, %v2361_v51 }
  0xdc   : > { %v1392_v10 = vshrl.u32 %v4918_v16, %v3009_v46  ;;  %v1326_v39 = vadd.s32 536870912, %v1325_v61  ;;  %v4919_v19 = vmov 2475754826   ;;  %v4920_v17 = vmov 2131351028  }
  0xdd   : > { %v1386_v2 = vshrl.u32 %v4919_v19, %v3009_v46  ;;  %v1389_v60 = vshrl.u32 %v4920_v17, %v3009_v46  ;;  %v1391_v56 = vshll.u32 %v4920_v17, %v2986_v27  ;;  %v1394_v43 = vshll.u32 %v4918_v16, %v2986_v27 }
  0xde   : > { %v1395_v24 = vshrl.u32 %v4894_v15, %v3009_v46  ;;  %v1398_v49 = vshrl.u32 %v4890_v28, %v3009_v46  ;;  %v2381_v6 = vadd.s32 4294967169, %v1681_v8  ;;  %v3184_v51 = vshrl.u32 %v1326_v39, 30 }
  0xdf   : > { %v4921_v5 = vmov 683565275   ;;  %v1388_v52 = vshll.u32 %v4919_v19, %v2986_v27  ;;  %v1375_v58 = vand.u32 8388607, %v4893_v22  ;;  %v1393_v29 = vor.u32 %v1392_v10, %v1391_v56 }
  0xe0   : > { %v1385_v21 = vshll.u32 %v4921_v5, %v2986_v27  ;;  %v1396_v11 = vor.u32 %v1395_v24, %v1394_v43  ;;  %v1397_v59 = vshll.u32 %v4894_v15, %v2986_v27  ;;  %v415_v47 = vadd.f32 %v399_v1, %v315_v7  ;;  %v251_v1 = vpop.permute.xlu1 %250 }
  0xe1   : > { %vm533_vm7 = vweird.f32 %v2824_v45  ;;  %v1328_v8 = vshll.u32 %v3184_v51, 30  ;;  %v1390_v28 = vor.u32 %v1389_v60, %v1388_v52  ;;  %vm535_vm8 = vcmp.lt.s32.totalorder %v3157_v13, 2 }
  0xe2   : > { %v1387_v39 = vor.u32 %v1386_v2, %v1385_v21  ;;  %vm536_vm9 = vcmp.eq.s32.totalorder %v3157_v13, 0  ;;  %v1399_v57 = vor.u32 %v1398_v49, %v1397_v59  ;;  %vm1403_vm10 = vcmp.lt.s32.totalorder %v2989_v31, 4  ;;  %v2617_v22 = vpop.eup %2616 }
  0xe3   : > { %vm539_vm11 = vcmp.eq.s32.totalorder %v3157_v13, 2  ;;  %v3200_v10 = vsub.s32 %v1325_v61, %v1328_v8  ;;  %v1384_v27 = vshrl.u32 %v4921_v5, %v3009_v46  ;;  %v1409_v7 = vsel %vm1403_vm10, %v1396_v11, 920167782 }
  0xe4   : > { %v540_v2 = vxor.u32 2147483648, %v2617_v22  ;;  %v1376_v60 = vor.u32 8388608, %v1375_v58  ;;  %vm1400_vm12 = vcmp.lt.s32.totalorder %v2989_v31, 1  ;;  %v1405_v59 = vsel %vm1403_vm10, %v1393_v29, 2102212464  ;;  %v2619_v56 = vpop.eup %2618 }
  0xe5   : > { %v1331_v43 = vsub.s32 0, %v3200_v10  ;;  %vm1402_vm13 = vcmp.lt.s32.totalorder %v2989_v31, 3  ;;  %v1408_v61 = vsel %vm1400_vm12, %v1387_v39, %v1390_v28  ;;  %v1412_v24 = vsel %vm1400_vm12, %v1390_v28, %v1393_v29 }
  0xe6   : > { %v537_v49 = vxor.u32 2147483648, %v2619_v56  ;;  %v541_v46 = vsel %vm539_vm11, %v540_v2, %v2619_v56  ;;  %v1410_v21 = vsel %vm1402_vm13, %v1393_v29, %v1409_v7  ;;  %v1413_v52 = vsel %vm1403_vm10, %v1399_v57, 1326507024 }
  0xe7   : > { %v2366_v58 = vmin.u32 %v1331_v43, %v3200_v10  ;;  %vm1401_vm14 = vcmp.lt.s32.totalorder %v2989_v31, 2  ;;  %v1404_v8 = vsel %vm1400_vm12, %v1384_v27, %v1387_v39  ;;  %v1406_v15 = vsel %vm1402_vm13, %v1390_v28, %v1405_v59  ;;  %v344_v28 = vpop.permute.xlu1 %343 }
  0xe8   : > { %v3216_v32 = vadd.f32 %v2821_v41, %v415_v47  ;;  %v538_v37 = vsel %vm536_vm9, %v2617_v22, %v537_v49  ;;  %v1411_v26 = vsel %vm1401_vm14, %v1408_v61, %v1410_v21  ;;  %v1414_v9 = vsel %vm1402_vm13, %v1396_v11, %v1413_v52 }
  0xe9   : > { %v542_v29 = vsel %vm535_vm8, %v538_v37, %v541_v46  ;;  %v1333_v7 = vclz %v2366_v58  ;;  %v1415_v2 = vsel %vm1401_vm14, %v1412_v24, %v1414_v9  ;;  %v1416_v57 = vshll.u32 %v1376_v60, 8 }
  0xea   : > { %v3223_v56 = vsub.s32 32, %v3162_v4  ;;  %v3226_v31 = vshrl.u32 %v3164_v48, 5  ;;  %v543_v47 = vsel %vm533_vm7, nan, %v542_v29  ;;  %v1407_v39 = vsel %vm1401_vm14, %v1404_v8, %v1406_v15 }
  0xeb   : > { %2463 = vmatprep.mubr.f32.mxu0 %v543_v47  ;;  %v2367_v22 = vadd.s32 4294967294, %v1333_v7  ;;  %v3230_v11 = vmul.u32.u64.low %v1416_v57, %v1415_v2  ;;  %v3231_v27 = vmul.u32.u64.high %v1416_v57, %v1415_v2, %v3230_v11  ;;  %v4902_v37 = vand.u32 2147483647, %v2939_v25 }
  0xec   : > { %v3234_v9 = vadd.s32 1, %v2381_v6  ;;  %v3237_v13 = vmul.f32 %v2814_v36, %v251_v1  ;;  %vm1267_vm15 = vcmp.lt.s32.totalorder %v2843_v0, 0  ;;  %v1783_v45 = vand.u32 2139095040, %v3216_v32 }
  0xed   : > { %v3240_v60 = vmul.u32.u64.low %v1416_v57, %v1411_v26  ;;  %v3241_v59 = vmul.u32.u64.high %v1416_v57, %v1411_v26, %v3240_v60  ;;  %v3246_v15 = vmul.f32 %v2812_v35, %v344_v28  ;;  %v1321_v43 = vadd.s32 %v3116_v14, %v3106_v53 }
  0xee   : > { %vm2368_vm0 = vcmp.lt.s32.totalorder %v2367_v22, 0  ;;  %v1351_v61 = vsub.s32 4, %v3184_v51  ;;  %v1423_v1 = vmul.u32 %v1416_v57, %v1407_v39  ;;  %v1489_v24 = vshrl.u32 %v4919_v19, %v3051_v50 }
  0xef   : > { %v1336_v6 = vsel %vm2368_vm0, 0, %v2367_v22  ;;  %v1478_v46 = vand.u32 8388607, %v4902_v37  ;;  %v1488_v21 = vshll.u32 %v4921_v5, %v3032_v30  ;;  %vm1425_vm1 = vc.u32 %v3231_v27, %v3240_v60 }
  0xf0   : > { %v1337_v49 = vsub.s32 32, %v1336_v6  ;;  %v1341_v26 = vsub.s32 4294967266, %v1336_v6  ;;  %v1426_v53 = vadd.s32 1, %v3241_v59  ;;  %v1491_v14 = vshll.u32 %v4919_v19, %v3032_v30 }
  0xf1   : > { %v1492_v52 = vshrl.u32 %v4920_v17, %v3051_v50  ;;  %v1338_v58 = vshll.u32 %v3200_v10, %v1336_v6  ;;  %v1495_v7 = vshrl.u32 %v4918_v16, %v3051_v50  ;;  %v1490_v57 = vor.u32 %v1489_v24, %v1488_v21 }
  0xf2   : > { %v1339_v8 = vshrl.u32 %v1321_v43, %v1337_v49  ;;  %v1342_v29 = vadd.s32 127, %v1341_v26  ;;  %v1427_v2 = vsel %vm1425_vm1, %v1426_v53, %v3241_v59  ;;  %v1497_v28 = vshll.u32 %v4918_v16, %v3032_v30 }
  0xf3   : > { %v4922_v47 = vmov 920167782   ;;  %v1428_v37 = vadd.s32 %v1427_v2, %v1423_v1  ;;  %v1494_v10 = vshll.u32 %v4920_v17, %v3032_v30  ;;  %v1493_v43 = vor.u32 %v1492_v52, %v1491_v14 }
  0xf4   : > { %v1498_v39 = vshrl.u32 %v4922_v47, %v3051_v50  ;;  %v1340_v22 = vor.u32 %v1339_v8, %v1338_v58  ;;  %v1343_v11 = vshll.u32 %v1342_v29, 23  ;;  %v1500_v49 = vshll.u32 %v4922_v47, %v3032_v30 }
  0xf5   : > { %v4923_v59 = vmov 1326507024   ;;  %v4924_v26 = vand.u32 2147483647, %v2843_v0  ;;  %v1352_v1 = vsel %vm1267_vm15, %v1351_v61, %v3184_v51  ;;  %v1429_v58 = vadd.s32 536870912, %v1428_v37 }
  0xf6   : > { %v1499_v6 = vor.u32 %v1498_v39, %v1497_v28  ;;  %v1501_v24 = vshrl.u32 %v4923_v59, %v3051_v50  ;;  %v1344_v53 = vor.u32 4788187, %v1343_v11  ;;  %v1496_v14 = vor.u32 %v1495_v7, %v1494_v10 }
  0xf7   : > { %vm3280_vm2 = vcmp.le.f32.partialorder %v4924_v26, 0.7853982  ;;  %vm1173_vm3 = vcmp.gt.s32.totalorder %v3170_v62, 0  ;;  %v1479_v52 = vor.u32 8388608, %v1478_v46  ;;  %v1487_v30 = vshrl.u32 %v4921_v5, %v3051_v50 }
  0xf8   : > { %v1502_v8 = vor.u32 %v1501_v24, %v1500_v49  ;;  %vm1503_vm4 = vcmp.lt.s32.totalorder %v3041_v38, 1  ;;  %v1345_v29 = vand.u32 2147483647, %v1344_v53  ;;  %v1347_v2 = vcvt.s32.f32 %v1340_v22 }
  0xf9   : > { %v1430_v28 = vshrl.u32 %v1429_v58, 30  ;;  %vm1506_vm5 = vcmp.lt.s32.totalorder %v3041_v38, 4  ;;  %vm1505_vm6 = vcmp.lt.s32.totalorder %v3041_v38, 3  ;;  %v1511_v51 = vsel %vm1503_vm4, %v1490_v57, %v1493_v43 }
  0xfa   : > { %v1512_v61 = vsel %vm1506_vm5, %v1499_v6, 920167782  ;;  %v1516_v7 = vsel %vm1506_vm5, %v1502_v8, 1326507024  ;;  %v1348_v39 = vmul.f32 %v1347_v2, %v1345_v29  ;;  %v1508_v11 = vsel %vm1506_vm5, %v1496_v14, 2102212464 }
  0xfb   : > { %v1431_v46 = vshll.u32 %v1430_v28, 30  ;;  %v1515_v50 = vsel %vm1503_vm4, %v1493_v43, %v1496_v14  ;;  %vm1504_vm7 = vcmp.lt.s32.totalorder %v3041_v38, 2  ;;  %v1513_v22 = vsel %vm1505_vm6, %v1496_v14, %v1512_v61 }
  0xfc   : > { %v1517_v10 = vsel %vm1505_vm6, %v1499_v6, %v1516_v7  ;;  %v1519_v49 = vshll.u32 %v1479_v52, 8  ;;  %v1349_v24 = vxor.u32 2147483648, %v1348_v39  ;;  %v1507_v53 = vsel %vm1503_vm4, %v1487_v30, %v1490_v57 }
  0xfd   : > { %v3302_v26 = vsub.s32 %v1428_v37, %v1431_v46  ;;  %v1514_v58 = vsel %vm1504_vm7, %v1511_v51, %v1513_v22  ;;  %v1509_v8 = vsel %vm1505_vm6, %v1493_v43, %v1508_v11  ;;  %v1518_v29 = vsel %vm1504_vm7, %v1515_v50, %v1517_v10 }
  0xfe   : > { %v3312_v14 = vmul.u32.u64.low %v1519_v49, %v1514_v58  ;;  %v3313_v2 = vmul.u32.u64.high %v1519_v49, %v1514_v58, %v3312_v14  ;;  %vm1688_vm8 = vcmp.gt.s32.totalorder %v3234_v9, 0  ;;  %v1784_v37 = vshrl.u32 %v1783_v45, 23 }
  0xff   : > { %v1350_v57 = vsel %vm1267_vm15, %v1349_v24, %v1348_v39  ;;  %v1434_v6 = vsub.s32 0, %v3302_v26  ;;  %v408_v43 = vadd.f32 %v3246_v15, %v3237_v13  ;;  %v1354_v61 = vsel %vm3280_vm2, 0, %v1352_v1 }
 0x100   : > { %v1353_v52 = vsel %vm3280_vm2, %v2843_v0, %v1350_v57  ;;  %v3327_v30 = vmul.u32.u64.low %v1519_v49, %v1518_v29  ;;  %v3328_v51 = vmul.u32.u64.high %v1519_v49, %v1518_v29, %v3327_v30  ;;  %v1510_v7 = vsel %vm1504_vm7, %v1507_v53, %v1509_v8 }
 0x101   : > { %2620 = vcosq.f32 %v1353_v52  ;;  %v2370_v45 = vmin.u32 %v1434_v6, %v3302_v26  ;;  %v1454_v39 = vsub.s32 4, %v1430_v28  ;;  %v1529_v13 = vadd.s32 1, %v3313_v2 }
 0x102   : > { %2622 = vsinq.f32 %v1353_v52  ;;  %v4903_v15 = vand.u32 2147483647, %v2956_v55  ;;  %v3338_v46 = vand.u32 31, %v3164_v48  ;;  %v3343_v21 = vsel %vm1173_vm3, %v3170_v62, 0 }
 0x103   : > { %v3348_v1 = vsel %vm1688_vm8, %v3234_v9, 0  ;;  %v1436_v38 = vclz %v2370_v45  ;;  %v3350_v11 = vadd.s32 4294967169, %v1784_v37  ;;  %v3352_v50 = vand.u32 3, %v1354_v61 }
 0x104   : > { %v1526_v22 = vmul.u32 %v1519_v49, %v1510_v7  ;;  %vm1528_vm9 = vc.u32 %v3328_v51, %v3312_v14  ;;  %v3357_v48 = vadd.f32 %v2821_v41, %v408_v43  ;;  %vm1370_vm10 = vcmp.lt.s32.totalorder %v2905_v54, 0 }
 0x105   : > { %v2371_v62 = vadd.s32 4294967294, %v1436_v38  ;;  %v1530_v10 = vsel %vm1528_vm9, %v1529_v13, %v3313_v2  ;;  %v1424_v9 = vadd.s32 %v3240_v60, %v3231_v27  ;;  %v3365_v24 = vsel %vm1370_vm10, %v1454_v39, %v1430_v28 }
 0x106   : > { %v1531_v53 = vadd.s32 %v1530_v10, %v1526_v22  ;;  %v3369_v49 = vand.u32 8388607, %v4903_v15  ;;  %v3373_v41 = vshrl.u32 %v4921_v5, %v3139_v33  ;;  %v562_v58 = vshrl.u32 %v4919_v19, %v3139_v33 }
 0x107   : > { %vm2372_vm11 = vcmp.lt.s32.totalorder %v2371_v62, 0  ;;  %v571_v27 = vshrl.u32 %v4922_v47, %v3139_v33  ;;  %vm1363_vm12 = vcmp.eq.s32.totalorder %v3352_v50, 2  ;;  %v565_v8 = vshrl.u32 %v4920_v17, %v3139_v33 }
 0x108   : > { %v1439_v60 = vsel %vm2372_vm11, 0, %v2371_v62  ;;  %v1532_v28 = vadd.s32 536870912, %v1531_v53  ;;  %v570_v29 = vshll.u32 %v4918_v16, %v3064_v12  ;;  %vm1360_vm13 = vcmp.eq.s32.totalorder %v3352_v50, 0 }
 0x109   : > { %v1440_v2 = vsub.s32 32, %v1439_v60  ;;  %v1444_v37 = vsub.s32 4294967266, %v1439_v60  ;;  %v561_v57 = vshll.u32 %v4921_v5, %v3064_v12  ;;  %v568_v6 = vshrl.u32 %v4918_v16, %v3139_v33 }
 0x10a   : > { %vm1359_vm14 = vcmp.lt.s32.totalorder %v3352_v50, 2  ;;  %v3390_v43 = vshrl.u32 %v1532_v28, 30  ;;  %v552_v52 = vor.u32 8388608, %v3369_v49  ;;  %v564_v30 = vshll.u32 %v4919_v19, %v3064_v12 }
 0x10b   : > { %v572_v61 = vor.u32 %v571_v27, %v570_v29  ;;  %vm1357_vm15 = vweird.f32 %v2843_v0  ;;  %v1441_v45 = vshll.u32 %v3302_v26, %v1439_v60  ;;  %v1442_v7 = vshrl.u32 %v1424_v9, %v1440_v2 }
 0x10c   : > { %v1445_v39 = vadd.s32 127, %v1444_v37  ;;  %v567_v13 = vshll.u32 %v4920_v17, %v3064_v12  ;;  %v1534_v38 = vshll.u32 %v3390_v43, 30  ;;  %v563_v22 = vor.u32 %v562_v58, %v561_v57 }
 0x10d   : > { %v566_v62 = vor.u32 %v565_v8, %v564_v30  ;;  %v574_v10 = vshrl.u32 %v4923_v59, %v3139_v33  ;;  %v1443_v49 = vor.u32 %v1442_v7, %v1441_v45  ;;  %vm579_vm0 = vcmp.lt.s32.totalorder %v3120_v40, 4 }
 0x10e   : > { %v1446_v28 = vshll.u32 %v1445_v39, 23  ;;  %v569_v15 = vor.u32 %v568_v6, %v567_v13  ;;  %v2621_v27 = vpop.eup %2620  ;;  %v3403_v29 = vsub.s32 %v1531_v53, %v1534_v38  ;;  %v573_v26 = vshll.u32 %v4922_v47, %v3064_v12 }
 0x10f   : > { %vm576_vm1 = vcmp.lt.s32.totalorder %v3120_v40, 1  ;;  %v585_v9 = vsel %vm579_vm0, %v572_v61, 920167782  ;;  %v2623_v58 = vpop.eup %2622  ;;  %v1364_v60 = vxor.u32 2147483648, %v2621_v27  ;;  %v4927_v33 = vand.u32 2147483647, %v2905_v54 }
 0x110   : > { %v1447_v2 = vor.u32 4788187, %v1446_v28  ;;  %vm577_vm3 = vcmp.lt.s32.totalorder %v3120_v40, 2  ;;  %vm578_vm4 = vcmp.lt.s32.totalorder %v3120_v40, 3  ;;  %v1361_v53 = vxor.u32 2147483648, %v2623_v58 }
 0x111   : > { %vm3412_vm2 = vcmp.le.f32.partialorder %v4927_v33, 0.7853982  ;;  %v1537_v12 = vsub.s32 0, %v3403_v29  ;;  %v575_v37 = vor.u32 %v574_v10, %v573_v26  ;;  %v584_v57 = vsel %vm576_vm1, %v563_v22, %v566_v62 }
 0x112   : > { %v1365_v6 = vsel %vm1363_vm12, %v1364_v60, %v2623_v58  ;;  %v1448_v30 = vand.u32 2147483647, %v1447_v2  ;;  %v1450_v45 = vcvt.s32.f32 %v1443_v49  ;;  %v586_v7 = vsel %vm578_vm4, %v569_v15, %v585_v9 }
 0x113   : > { %v1362_v39 = vsel %vm1360_vm13, %v2621_v27, %v1361_v53  ;;  %v2374_v13 = vmin.u32 %v1537_v12, %v3403_v29  ;;  %v1557_v38 = vsub.s32 4, %v3390_v43  ;;  %v581_v10 = vsel %vm579_vm0, %v569_v15, 2102212464 }
 0x114   : > { %v1366_v28 = vsel %vm1359_vm14, %v1362_v39, %v1365_v6  ;;  %v1451_v26 = vmul.f32 %v1450_v45, %v1448_v30  ;;  %v587_v49 = vsel %vm577_vm3, %v584_v57, %v586_v7  ;;  %v588_v9 = vsel %vm576_vm1, %v566_v62, %v569_v15  ;;  %v376_v39 = vpop.permute.xlu1 %375 }
 0x115   : > { %v1367_v27 = vsel %vm1357_vm15, nan, %v1366_v28  ;;  %v1539_v58 = vclz %v2374_v13  ;;  %v589_v60 = vsel %vm579_vm0, %v575_v37, 1326507024  ;;  %v592_v33 = vshll.u32 %v552_v52, 8 }
 0x116   : > { %2475 = vmatprep.mubr.f32.mxu1 %v1367_v27  ;;  %v1452_v2 = vxor.u32 2147483648, %v1451_v26  ;;  %v580_v50 = vsel %vm576_vm1, %v3373_v41, %v563_v22  ;;  %v582_v53 = vsel %vm578_vm4, %v566_v62, %v581_v10  ;;  %v590_v15 = vsel %vm578_vm4, %v572_v61, %v589_v60 }
 0x117   : > { %v2375_v12 = vadd.s32 4294967294, %v1539_v58  ;;  %v591_v0 = vsel %vm577_vm3, %v588_v9, %v590_v15  ;;  %v3450_v57 = vmul.u32.u64.low %v592_v33, %v587_v49  ;;  %v3451_v6 = vmul.u32.u64.high %v592_v33, %v587_v49, %v3450_v57 }
 0x118   : > { %v1453_v52 = vsel %vm1370_vm10, %v1452_v2, %v1451_v26  ;;  %vm1473_vm5 = vcmp.lt.s32.totalorder %v2939_v25, 0  ;;  %v3457_v41 = vmul.u32.u64.low %v592_v33, %v591_v0  ;;  %v3458_v22 = vmul.u32.u64.high %v592_v33, %v591_v0, %v3457_v41 }
 0x119   : > { %v1456_v61 = vsel %vm3412_vm2, %v2905_v54, %v1453_v52  ;;  %v1457_v62 = vsel %vm3412_vm2, 0, %v3365_v24  ;;  %v1527_v37 = vadd.s32 %v3312_v14, %v3328_v51  ;;  %vm2376_vm6 = vcmp.lt.s32.totalorder %v2375_v12, 0 }
 0x11a   : > { %2624 = vcosq.f32 %v1456_v61  ;;  %v1542_v30 = vsel %vm2376_vm6, 0, %v2375_v12  ;;  %v3471_v45 = vsel %vm1473_vm5, %v1557_v38, %v3390_v43  ;;  %v583_v7 = vsel %vm577_vm3, %v580_v50, %v582_v53 }
 0x11b   : > { %2626 = vsinq.f32 %v1456_v61  ;;  %v1543_v13 = vsub.s32 32, %v1542_v30  ;;  %v1547_v10 = vsub.s32 4294967266, %v1542_v30  ;;  %v647_v24 = vand.u32 2147483647, %v2934_v18 }
 0x11c   : > { %v3476_v8 = vand.u32 3, %v1457_v62  ;;  %v4930_v14 = vand.u32 2147483647, %v2939_v25  ;;  %vm601_vm8 = vc.u32 %v3458_v22, %v3450_v57  ;;  %v602_v40 = vadd.s32 1, %v3451_v6 }
 0x11d   : > { %v1544_v43 = vshll.u32 %v3403_v29, %v1542_v30  ;;  %v1545_v38 = vshrl.u32 %v1527_v37, %v1543_v13  ;;  %v1548_v28 = vadd.s32 127, %v1547_v10  ;;  %v599_v26 = vmul.u32 %v592_v33, %v583_v7 }
 0x11e   : > { %vm3480_vm7 = vcmp.le.f32.partialorder %v4930_v14, 0.7853982  ;;  %v1062_v49 = vand.u32 2139095040, %v3357_v48  ;;  %v3490_v9 = vmul.f32 %v2812_v35, %v376_v39  ;;  %v603_v58 = vsel %vm601_vm8, %v602_v40, %v3451_v6 }
 0x11f   : > { %v1560_v27 = vsel %vm3480_vm7, 0, %v3471_v45  ;;  %v1546_v60 = vor.u32 %v1545_v38, %v1544_v43  ;;  %v1549_v2 = vshll.u32 %v1548_v28, 23  ;;  %v604_v50 = vadd.s32 %v603_v58, %v599_v26 }
 0x120   : > { %v654_v29 = vand.u32 8388607, %v647_v24  ;;  %v665_v33 = vshrl.u32 %v4919_v19, %v3039_v34  ;;  %v668_v53 = vshrl.u32 %v4920_v17, %v3039_v34  ;;  %v671_v15 = vshrl.u32 %v4918_v16, %v3039_v34 }
 0x121   : > { %v674_v12 = vshrl.u32 %v4922_v47, %v3039_v34  ;;  %vm1466_vm9 = vcmp.eq.s32.totalorder %v3476_v8, 2  ;;  %v1550_v0 = vor.u32 4788187, %v1549_v2  ;;  %v605_v6 = vadd.s32 536870912, %v604_v50 }
 0x122   : > { %v664_v52 = vshll.u32 %v4921_v5, %v3018_v3  ;;  %v673_v41 = vshll.u32 %v4918_v16, %v3018_v3  ;;  %vm1463_vm10 = vcmp.eq.s32.totalorder %v3476_v8, 0  ;;  %v667_v61 = vshll.u32 %v4919_v19, %v3018_v3 }
 0x123   : > { %v670_v62 = vshll.u32 %v4920_v17, %v3018_v3  ;;  %v676_v37 = vshll.u32 %v4922_v47, %v3018_v3  ;;  %v677_v30 = vshrl.u32 %v4923_v59, %v3039_v34  ;;  %vm1462_vm11 = vcmp.lt.s32.totalorder %v3476_v8, 2 }
 0x124   : > { %v1551_v7 = vand.u32 2147483647, %v1550_v0  ;;  %v1553_v39 = vcvt.s32.f32 %v1546_v60  ;;  %v3521_v13 = vshrl.u32 %v605_v6, 30  ;;  %v675_v10 = vor.u32 %v674_v12, %v673_v41 }
 0x125   : > { %v666_v14 = vor.u32 %v665_v33, %v664_v52  ;;  %v669_v40 = vor.u32 %v668_v53, %v667_v61  ;;  %v672_v43 = vor.u32 %v671_v15, %v670_v62  ;;  %v678_v38 = vor.u32 %v677_v30, %v676_v37 }
 0x126   : > { %v1554_v28 = vmul.f32 %v1553_v39, %v1551_v7  ;;  %v607_v26 = vshll.u32 %v3521_v13, 30  ;;  %v663_v3 = vshrl.u32 %v4921_v5, %v3039_v34  ;;  %vm682_vm12 = vcmp.lt.s32.totalorder %v3028_v23, 4 }
 0x127   : > { %v655_v58 = vor.u32 8388608, %v654_v29  ;;  %vm679_vm13 = vcmp.lt.s32.totalorder %v3028_v23, 1  ;;  %vm680_vm14 = vcmp.lt.s32.totalorder %v3028_v23, 2  ;;  %v692_v60 = vsel %vm682_vm12, %v678_v38, 1326507024  ;;  %v2625_v2 = vpop.eup %2624 }
 0x128   : > { %v1555_v12 = vxor.u32 2147483648, %v1554_v28  ;;  %v3529_v33 = vsub.s32 %v604_v50, %v607_v26  ;;  %vm681_vm15 = vcmp.lt.s32.totalorder %v3028_v23, 3  ;;  %v688_v53 = vsel %vm682_vm12, %v675_v10, 920167782  ;;  %v2627_v15 = vpop.eup %2626 }
 0x129   : > { %v1467_v0 = vxor.u32 2147483648, %v2625_v2  ;;  %v683_v34 = vsel %vm679_vm13, %v663_v3, %v666_v14  ;;  %v684_v6 = vsel %vm682_vm12, %v672_v43, 2102212464  ;;  %v691_v29 = vsel %vm679_vm13, %v669_v40, %v672_v43 }
 0x12a   : > { %v1464_v52 = vxor.u32 2147483648, %v2627_v15  ;;  %v1556_v41 = vsel %vm1473_vm5, %v1555_v12, %v1554_v28  ;;  %v610_v61 = vsub.s32 0, %v3529_v33  ;;  %v693_v50 = vsel %vm681_vm15, %v675_v10, %v692_v60 }
 0x12b   : > { %v1468_v62 = vsel %vm1466_vm9, %v1467_v0, %v2627_v15  ;;  %v1559_v37 = vsel %vm3480_vm7, %v2939_v25, %v1556_v41  ;;  %v687_v30 = vsel %vm679_vm13, %v666_v14, %v669_v40  ;;  %v689_v7 = vsel %vm681_vm15, %v672_v43, %v688_v53 }
 0x12c   : > { %v1465_v39 = vsel %vm1463_vm10, %v2625_v2, %v1464_v52  ;;  %2628 = vcosq.f32 %v1559_v37  ;;  %v2338_v38 = vmin.u32 %v610_v61, %v3529_v33  ;;  %v685_v10 = vsel %vm681_vm15, %v669_v40, %v684_v6 }
 0x12d   : > { %vm1460_vm0 = vweird.f32 %v2905_v54  ;;  %v1469_v28 = vsel %vm1462_vm11, %v1465_v39, %v1468_v62  ;;  %2630 = vsinq.f32 %v1559_v37  ;;  %v694_v14 = vsel %vm680_vm14, %v691_v29, %v693_v50 }
 0x12e   : > { %v1470_v26 = vsel %vm1460_vm0, nan, %v1469_v28  ;;  %v612_v43 = vclz %v2338_v38  ;;  %v690_v3 = vsel %vm680_vm14, %v687_v30, %v689_v7  ;;  %v695_v60 = vshll.u32 %v655_v58, 8 }
 0x12f   : > { %v3563_v2 = vand.u32 31, %v3343_v21  ;;  %v3566_v40 = vand.u32 31, %v3348_v1  ;;  %2476 = vmatmul.mubr.f32.vlgmr.msra.gmra.mxu1 %v1470_v26  ;;  %v3572_v54 = vand.u32 3, %v1560_v27  ;;  %v686_v8 = vsel %vm680_vm14, %v683_v34, %v685_v10 }
 0x130   : > { %v2339_v12 = vadd.s32 4294967294, %v612_v43  ;;  %v3576_v53 = vmul.u32.u64.low %v695_v60, %v694_v14  ;;  %v3577_v15 = vmul.u32.u64.high %v695_v60, %v694_v14, %v3576_v53  ;;  %v4905_v58 = vand.u32 2147483647, %v2970_v20 }
 0x131   : > { %v3581_v0 = vadd.s32 1, %v3350_v11  ;;  %v3585_v6 = vadd.f32 %v3490_v9, %v2993_v63  ;;  %v3587_v51 = vmul.u32.u64.low %v695_v60, %v690_v3  ;;  %v3588_v45 = vmul.u32.u64.high %v695_v60, %v690_v3, %v3587_v51 }
 0x132   : > { %v3593_v23 = vshrl.u32 %v1062_v49, 23  ;;  %v600_v27 = vadd.s32 %v3450_v57, %v3458_v22  ;;  %vm2340_vm1 = vcmp.lt.s32.totalorder %v2339_v12, 0  ;;  %v630_v34 = vsub.s32 4, %v3521_v13 }
 0x133   : > { %vm1569_vm2 = vcmp.eq.s32.totalorder %v3572_v54, 2  ;;  %v615_v11 = vsel %vm2340_vm1, 0, %v2339_v12  ;;  %v702_v29 = vmul.u32 %v695_v60, %v686_v8  ;;  %v3601_v63 = vshrl.u32 %v4921_v5, %v3147_v44 }
 0x134   : > { %v1591_v9 = vshll.u32 %v4921_v5, %v3122_v42  ;;  %vm1566_vm3 = vcmp.eq.s32.totalorder %v3572_v54, 0  ;;  %v616_v49 = vsub.s32 32, %v615_v11  ;;  %v620_v52 = vsub.s32 4294967266, %v615_v11 }
 0x135   : > { %v3608_v57 = vand.u32 8388607, %v4905_v58  ;;  %v1592_v22 = vshrl.u32 %v4919_v19, %v3147_v44  ;;  %vm1565_vm4 = vcmp.lt.s32.totalorder %v3572_v54, 2  ;;  %vm704_vm5 = vc.u32 %v3577_v15, %v3587_v51 }
 0x136   : > { %v705_v41 = vadd.s32 1, %v3588_v45  ;;  %v1594_v61 = vshll.u32 %v4919_v19, %v3122_v42  ;;  %v1595_v50 = vshrl.u32 %v4920_v17, %v3147_v44  ;;  %vm1563_vm6 = vweird.f32 %v2939_v25 }
 0x137   : > { %v617_v62 = vshll.u32 %v3529_v33, %v615_v11  ;;  %v618_v37 = vshrl.u32 %v600_v27, %v616_v49  ;;  %v621_v30 = vadd.s32 127, %v620_v52  ;;  %v1598_v7 = vshrl.u32 %v4918_v16, %v3147_v44 }
 0x138   : > { %vm546_vm7 = vcmp.lt.s32.totalorder %v2956_v55, 0  ;;  %v706_v39 = vsel %vm704_vm5, %v705_v41, %v3588_v45  ;;  %v1600_v38 = vshll.u32 %v4918_v16, %v3122_v42  ;;  %v1601_v10 = vshrl.u32 %v4922_v47, %v3147_v44 }
 0x139   : > { %v1604_v28 = vshrl.u32 %v4923_v59, %v3147_v44  ;;  %v619_v14 = vor.u32 %v618_v37, %v617_v62  ;;  %v622_v33 = vshll.u32 %v621_v30, 23  ;;  %v707_v26 = vadd.s32 %v706_v39, %v702_v29  ;;  %v2629_v3 = vpop.eup %2628  ;;  %v4936_v30 = vld [vmem:[#allocation7_spill] sm:$0xff] }
 0x13a   : > { %v1582_v43 = vor.u32 8388608, %v3608_v57  ;;  %v1593_v60 = vor.u32 %v1592_v22, %v1591_v9  ;;  %v1597_v8 = vshll.u32 %v4920_v17, %v3122_v42  ;;  %v1602_v12 = vor.u32 %v1601_v10, %v1600_v38  ;;  %v2631_v45 = vpop.eup %2630 }
 0x13b   : > { %v1603_v53 = vshll.u32 %v4922_v47, %v3122_v42  ;;  %v1570_v27 = vxor.u32 2147483648, %v2629_v3  ;;  %v4933_v11 = vand.u32 2147483647, %v2956_v55  ;;  %v623_v29 = vor.u32 4788187, %v622_v33 }
 0x13c   : > { %v708_v49 = vadd.s32 536870912, %v707_v26  ;;  %v1596_v52 = vor.u32 %v1595_v50, %v1594_v61  ;;  %vm1791_vm9 = vcmp.gt.s32.totalorder %v3581_v0, 0  ;;  %v1567_v9 = vxor.u32 2147483648, %v2631_v45 }
 0x13d   : > { %vm3639_vm8 = vcmp.le.f32.partialorder %v4933_v11, 0.7853982  ;;  %v626_v57 = vcvt.s32.f32 %v619_v14  ;;  %v1599_v22 = vor.u32 %v1598_v7, %v1597_v8  ;;  %v1605_v41 = vor.u32 %v1604_v28, %v1603_v53  ;;  %v296_v28 = vpop.permute.xlu1 %295 }
 0x13e   : > { %v1571_v42 = vsel %vm1569_vm2, %v1570_v27, %v2631_v45  ;;  %v624_v62 = vand.u32 2147483647, %v623_v29  ;;  %v3646_v37 = vshrl.u32 %v708_v49, 30  ;;  %vm1609_vm10 = vcmp.lt.s32.totalorder %v4936_v30, 4 }
 0x13f   : > { %v1568_v39 = vsel %vm1566_vm3, %v2629_v3, %v1567_v9  ;;  %vm1606_vm11 = vcmp.lt.s32.totalorder %v4936_v30, 1  ;;  %vm1608_vm12 = vcmp.lt.s32.totalorder %v4936_v30, 3  ;;  %v1615_v61 = vsel %vm1609_vm10, %v1602_v12, 920167782 }
 0x140   : > { %v1572_v50 = vsel %vm1565_vm4, %v1568_v39, %v1571_v42  ;;  %v627_v7 = vmul.f32 %v626_v57, %v624_v62  ;;  %v710_v38 = vshll.u32 %v3646_v37, 30  ;;  %v1614_v10 = vsel %vm1606_vm11, %v1593_v60, %v1596_v52 }
 0x141   : > { %v1573_v14 = vsel %vm1563_vm6, nan, %v1572_v50  ;;  %v1616_v33 = vsel %vm1608_vm12, %v1599_v22, %v1615_v61  ;;  %v1618_v3 = vsel %vm1606_vm11, %v1596_v52, %v1599_v22  ;;  %v1619_v54 = vsel %vm1609_vm10, %v1605_v41, 1326507024  ;;  %v380_v42 = vpop.permute.xlu1 %379 }
 0x142   : > { %2478 = vmatprep.mubr.f32.mxu1 %v1573_v14  ;;  %v628_v8 = vxor.u32 2147483648, %v627_v7  ;;  %v631_v53 = vsel %vm546_vm7, %v630_v34, %v3521_v13  ;;  %v3673_v45 = vsub.s32 %v707_v26, %v710_v38  ;;  %v1611_v25 = vsel %vm1609_vm10, %v1599_v22, 2102212464  ;;  %v3727_v38 = vld [vmem:[%s4869_s2] ss:$0 sm:$0xff] }
 0x143   : > { %vm1607_vm13 = vcmp.lt.s32.totalorder %v4936_v30, 2  ;;  %v1610_v27 = vsel %vm1606_vm11, %v3601_v63, %v1593_v60  ;;  %v1620_v11 = vsel %vm1608_vm12, %v1602_v12, %v1619_v54  ;;  %v1622_v29 = vshll.u32 %v1582_v43, 8 }
 0x144   : > { %v629_v49 = vsel %vm546_vm7, %v628_v8, %v627_v7  ;;  %v713_v13 = vsub.s32 0, %v3673_v45  ;;  %v1617_v34 = vsel %vm1607_vm13, %v1614_v10, %v1616_v33  ;;  %v1621_v26 = vsel %vm1607_vm13, %v1618_v3, %v1620_v11 }
 0x145   : > { %v632_v9 = vsel %vm3639_vm8, %v2956_v55, %v629_v49  ;;  %v1612_v63 = vsel %vm1608_vm12, %v1596_v52, %v1611_v25  ;;  %v3695_v60 = vmul.u32.u64.low %v1622_v29, %v1621_v26  ;;  %v3696_v43 = vmul.u32.u64.high %v1622_v29, %v1621_v26, %v3695_v60 }
 0x146   : > { %v3699_v12 = vsub.s32 32, %v3338_v46  ;;  %v633_v57 = vsel %vm3639_vm8, 0, %v631_v53  ;;  %2632 = vcosq.f32 %v632_v9  ;;  %v2342_v22 = vmin.u32 %v713_v13, %v3673_v45  ;;  %v4938_v53 = vld [vmem:[#allocation8_spill] sm:$0xff] }
 0x147   : > { %v3705_v41 = vsub.s32 32, %v3563_v2  ;;  %2634 = vsinq.f32 %v632_v9  ;;  %v3707_v62 = vmul.u32.u64.low %v1622_v29, %v1617_v34  ;;  %v3708_v39 = vmul.u32.u64.high %v1622_v29, %v1617_v34, %v3707_v62 }
 0x148   : > { %v3712_v52 = vsub.s32 32, %v3566_v40  ;;  %v3717_v44 = vsel %vm1791_vm9, %v3581_v0, 0  ;;  %v715_v61 = vclz %v2342_v22  ;;  %v1613_v50 = vsel %vm1607_vm13, %v1610_v27, %v1612_v63 }
 0x149   : > { %v3722_v7 = vadd.s32 4294967169, %v3593_v23  ;;  %v3731_v10 = vadd.f32 %v3727_v38, %v3585_v6  ;;  %v3734_v14 = vmul.f32 %v2814_v36, %v296_v28  ;;  %v3736_v0 = vand.u32 3, %v633_v57  ;;  %v4937_v23 = vld [vmem:[#allocation2_spill] sm:$0xff] }
 0x14a   : > { %v3739_v30 = vmul.f32 %v2812_v35, %v380_v42  ;;  %v2343_v33 = vadd.s32 4294967294, %v715_v61  ;;  %vm1631_vm14 = vc.u32 %v3696_v43, %v3707_v62  ;;  %v4904_v3 = vand.u32 2147483647, %v4937_v23  ;;  %v4939_v28 = vld [vmem:[#allocation10_spill] sm:$0xff] }
 0x14b   : > { %v703_v54 = vadd.s32 %v3587_v51, %v3577_v15  ;;  %v1629_v8 = vmul.u32 %v1622_v29, %v1613_v50  ;;  %v1632_v6 = vadd.s32 1, %v3708_v39  ;;  %v767_v36 = vshll.u32 %v4921_v5, %v4938_v53 }
 0x14c   : > { %vm2344_vm15 = vcmp.lt.s32.totalorder %v2343_v33, 0  ;;  %v768_v35 = vshrl.u32 %v4919_v19, %v4939_v28  ;;  %v771_v25 = vshrl.u32 %v4920_v17, %v4939_v28  ;;  %v774_v27 = vshrl.u32 %v4918_v16, %v4939_v28 }
 0x14d   : > { %vm642_vm0 = vcmp.eq.s32.totalorder %v3736_v0, 2  ;;  %v718_v11 = vsel %vm2344_vm15, 0, %v2343_v33  ;;  %v1633_v15 = vsel %vm1631_vm14, %v1632_v6, %v3708_v39  ;;  %v776_v51 = vshll.u32 %v4918_v16, %v4938_v53 }
 0x14e   : > { %v777_v29 = vshrl.u32 %v4922_v47, %v4939_v28  ;;  %vm639_vm1 = vcmp.eq.s32.totalorder %v3736_v0, 0  ;;  %v719_v49 = vsub.s32 32, %v718_v11  ;;  %v723_v13 = vsub.s32 4294967266, %v718_v11 }
 0x14f   : > { %v1634_v34 = vadd.s32 %v1633_v15, %v1629_v8  ;;  %v757_v26 = vand.u32 8388607, %v4904_v3  ;;  %vm638_vm2 = vcmp.lt.s32.totalorder %v3736_v0, 2  ;;  %v770_v9 = vshll.u32 %v4919_v19, %v4938_v53  ;;  %v4940_v3 = vld [vmem:[#allocation9_spill] sm:$0xff] }
 0x150   : > { %v773_v63 = vshll.u32 %v4920_v17, %v4938_v53  ;;  %v778_v60 = vor.u32 %v777_v29, %v776_v51  ;;  %v780_v57 = vshrl.u32 %v4923_v59, %v4939_v28  ;;  %vm636_vm3 = vweird.f32 %v2956_v55 }
 0x151   : > { %v720_v22 = vshll.u32 %v3673_v45, %v718_v11  ;;  %v721_v42 = vshrl.u32 %v703_v54, %v719_v49  ;;  %v724_v39 = vadd.s32 127, %v723_v13  ;;  %v1635_v61 = vadd.s32 536870912, %v1634_v34 }
 0x152   : > { %v769_v50 = vor.u32 %v768_v35, %v767_v36  ;;  %v772_v33 = vor.u32 %v771_v25, %v770_v9  ;;  %v775_v8 = vor.u32 %v774_v27, %v773_v63  ;;  %v779_v6 = vshll.u32 %v4922_v47, %v4938_v53 }
 0x153   : > { %vm649_vm4 = vcmp.lt.s32.totalorder %v2934_v18, 0  ;;  %v722_v15 = vor.u32 %v721_v42, %v720_v22  ;;  %v725_v51 = vshll.u32 %v724_v39, 23  ;;  %v3776_v29 = vshrl.u32 %v1635_v61, 30  ;;  %v2633_v58 = vpop.eup %2632 }
 0x154   : > { %vm785_vm5 = vcmp.lt.s32.totalorder %v4940_v3, 4  ;;  %v733_v45 = vsub.s32 4, %v3646_v37  ;;  %v758_v54 = vor.u32 8388608, %v757_v26  ;;  %v781_v11 = vor.u32 %v780_v57, %v779_v6  ;;  %v2635_v35 = vpop.eup %2634 }
 0x155   : > { %v791_v36 = vsel %vm785_vm5, %v778_v60, 920167782  ;;  %v643_v25 = vxor.u32 2147483648, %v2633_v58  ;;  %v726_v27 = vor.u32 4788187, %v725_v51  ;;  %v1637_v53 = vshll.u32 %v3776_v29, 30 }
 0x156   : > { %vm782_vm6 = vcmp.lt.s32.totalorder %v4940_v3, 1  ;;  %v640_v49 = vxor.u32 2147483648, %v2635_v35  ;;  %v729_v13 = vcvt.s32.f32 %v722_v15  ;;  %vm784_vm7 = vcmp.lt.s32.totalorder %v4940_v3, 3 }
 0x157   : > { %v790_v9 = vsel %vm782_vm6, %v769_v50, %v772_v33  ;;  %v644_v26 = vsel %vm642_vm0, %v643_v25, %v2635_v35  ;;  %v727_v63 = vand.u32 2147483647, %v726_v27  ;;  %v3789_v57 = vsub.s32 %v1634_v34, %v1637_v53 }
 0x158   : > { %v792_v22 = vsel %vm784_vm7, %v775_v8, %v791_v36  ;;  %v641_v42 = vsel %vm639_vm1, %v2633_v58, %v640_v49  ;;  %vm783_vm8 = vcmp.lt.s32.totalorder %v4940_v3, 2  ;;  %v794_v39 = vsel %vm782_vm6, %v772_v33, %v775_v8 }
 0x159   : > { %v795_v61 = vsel %vm785_vm5, %v781_v11, 1326507024  ;;  %v645_v6 = vsel %vm638_vm2, %v641_v42, %v644_v26  ;;  %v730_v15 = vmul.f32 %v729_v13, %v727_v63  ;;  %v1640_v34 = vsub.s32 0, %v3789_v57 }
 0x15a   : > { %v787_v51 = vsel %vm785_vm5, %v775_v8, 2102212464  ;;  %v646_v58 = vsel %vm636_vm3, nan, %v645_v6  ;;  %v766_v36 = vshrl.u32 %v4921_v5, %v4939_v28  ;;  %v793_v35 = vsel %vm783_vm8, %v790_v9, %v792_v22 }
 0x15b   : > { %v796_v11 = vsel %vm784_vm7, %v778_v60, %v795_v61  ;;  %2464 = vmatmul.mubr.f32.vlgmr.msra.gmra.mxu0 %v646_v58  ;;  %v731_v0 = vxor.u32 2147483648, %v730_v15  ;;  %v2378_v25 = vmin.u32 %v1640_v34, %v3789_v57  ;;  %v798_v8 = vshll.u32 %v758_v54, 8 }
 0x15c   : > { %v797_v27 = vsel %vm783_vm8, %v794_v39, %v796_v11  ;;  %vm3818_vm9 = vcmp.le.f32.partialorder %v647_v24, 0.7853982  ;;  %v734_v28 = vsel %vm649_vm4, %v733_v45, %v3646_v37  ;;  %v786_v60 = vsel %vm782_vm6, %v766_v36, %v769_v50  ;;  %v4943_v39 = vld [vmem:[#allocation4_spill] sm:$0xff] }
 0x15d   : > { %v788_v53 = vsel %vm784_vm7, %v772_v33, %v787_v51  ;;  %v732_v49 = vsel %vm649_vm4, %v731_v0, %v730_v15  ;;  %v1642_v54 = vclz %v2378_v25  ;;  %v1886_v24 = vand.u32 2139095040, %v3731_v10 }
 0x15e   : > { %v3831_v13 = vmul.u32.u64.low %v798_v8, %v797_v27  ;;  %v3832_v9 = vmul.u32.u64.high %v798_v8, %v797_v27, %v3831_v13  ;;  %v735_v26 = vsel %vm3818_vm9, %v2934_v18, %v732_v49  ;;  %v736_v50 = vsel %vm3818_vm9, 0, %v734_v28 }
 0x15f   : > { %v3838_v37 = vmul.u32.u64.low %v798_v8, %v793_v35  ;;  %v3839_v45 = vmul.u32.u64.high %v798_v8, %v793_v35, %v3838_v37  ;;  %2636 = vcosq.f32 %v735_v26  ;;  %v2379_v33 = vadd.s32 4294967294, %v1642_v54 }
 0x160   : > { %v1660_v63 = vsub.s32 4, %v3776_v29  ;;  %v3847_v22 = vadd.f32 %v3739_v30, %v3734_v14  ;;  %2638 = vsinq.f32 %v735_v26  ;;  %v789_v42 = vsel %vm783_vm8, %v786_v60, %v788_v53 }
 0x161   : > { %v853_v61 = vand.u32 2147483647, %v4943_v39  ;;  %v4944_v6 = vand.u32 2147483647, %v2970_v20  ;;  %vm1576_vm11 = vcmp.lt.s32.totalorder %v2970_v20, 0  ;;  %vm2380_vm12 = vcmp.lt.s32.totalorder %v2379_v33, 0 }
 0x162   : > { %vm807_vm13 = vc.u32 %v3832_v9, %v3838_v37  ;;  %v3861_v14 = vand.u32 3, %v736_v50  ;;  %v1630_v30 = vadd.s32 %v3707_v62, %v3696_v43  ;;  %v1645_v3 = vsel %vm2380_vm12, 0, %v2379_v33 }
 0x163   : > { %vm3854_vm10 = vcmp.le.f32.partialorder %v4944_v6, 0.7853982  ;;  %v808_v34 = vadd.s32 1, %v3839_v45  ;;  %v1646_v51 = vsub.s32 32, %v1645_v3  ;;  %v1650_v58 = vsub.s32 4294967266, %v1645_v3 }
 0x164   : > { %v3869_v36 = vsel %vm1576_vm11, %v1660_v63, %v3776_v29  ;;  %v805_v35 = vmul.u32 %v798_v8, %v789_v42  ;;  %v1647_v11 = vshll.u32 %v3789_v57, %v1645_v3  ;;  %v3875_v25 = vand.u32 8388607, %v853_v61 }
 0x165   : > { %v809_v0 = vsel %vm807_vm13, %v808_v34, %v3839_v45  ;;  %v871_v43 = vshrl.u32 %v4919_v19, %v3699_v12  ;;  %v1648_v62 = vshrl.u32 %v1630_v30, %v1646_v51  ;;  %v1651_v27 = vadd.s32 127, %v1650_v58 }
 0x166   : > { %v810_v55 = vadd.s32 %v809_v0, %v805_v35  ;;  %v874_v28 = vshrl.u32 %v4920_v17, %v3699_v12  ;;  %v877_v29 = vshrl.u32 %v4918_v16, %v3699_v12  ;;  %v879_v57 = vshll.u32 %v4918_v16, %v3338_v46 }
 0x167   : > { %v880_v8 = vshrl.u32 %v4922_v47, %v3699_v12  ;;  %v882_v60 = vshll.u32 %v4922_v47, %v3338_v46  ;;  %vm742_vm14 = vcmp.eq.s32.totalorder %v3861_v14, 0  ;;  %v1649_v53 = vor.u32 %v1648_v62, %v1647_v11 }
 0x168   : > { %v1652_v49 = vshll.u32 %v1651_v27, 23  ;;  %v811_v54 = vadd.s32 536870912, %v810_v55  ;;  %v883_v13 = vshrl.u32 %v4923_v59, %v3699_v12  ;;  %vm741_vm15 = vcmp.lt.s32.totalorder %v3861_v14, 2 }
 0x169   : > { %v870_v26 = vshll.u32 %v4921_v5, %v3338_v46  ;;  %v873_v45 = vshll.u32 %v4919_v19, %v3338_v46  ;;  %v876_v50 = vshll.u32 %v4920_v17, %v3338_v46  ;;  %v881_v33 = vor.u32 %v880_v8, %v879_v57 }
 0x16a   : > { %vm739_vm0 = vweird.f32 %v2934_v18  ;;  %vm745_vm1 = vcmp.eq.s32.totalorder %v3861_v14, 2  ;;  %v1653_v63 = vor.u32 4788187, %v1652_v49  ;;  %v3901_v42 = vshrl.u32 %v811_v54, 30 }
 0x16b   : > { %v884_v6 = vor.u32 %v883_v13, %v882_v60  ;;  %v1663_v30 = vsel %vm3854_vm10, 0, %v3869_v36  ;;  %v872_v3 = vor.u32 %v871_v43, %v870_v26  ;;  %v875_v34 = vor.u32 %v874_v28, %v873_v45 }
 0x16c   : > { %v878_v51 = vor.u32 %v877_v29, %v876_v50  ;;  %v1654_v58 = vand.u32 2147483647, %v1653_v63  ;;  %v1656_v35 = vcvt.s32.f32 %v1649_v53  ;;  %v813_v46 = vshll.u32 %v3901_v42, 30  ;;  %v2637_v11 = vpop.eup %2636 }
 0x16d   : > { %vm888_vm2 = vcmp.lt.s32.totalorder %v3226_v31, 4  ;;  %v861_v0 = vor.u32 8388608, %v3875_v25  ;;  %v869_v62 = vshrl.u32 %v4921_v5, %v3699_v12  ;;  %vm885_vm3 = vcmp.lt.s32.totalorder %v3226_v31, 1  ;;  %v2639_v43 = vpop.eup %2638 }
 0x16e   : > { %v894_v36 = vsel %vm888_vm2, %v881_v33, 920167782  ;;  %v746_v27 = vxor.u32 2147483648, %v2637_v11  ;;  %v1657_v28 = vmul.f32 %v1656_v35, %v1654_v58  ;;  %v3914_v29 = vsub.s32 %v810_v55, %v813_v46 }
 0x16f   : > { %v898_v57 = vsel %vm888_vm2, %v884_v6, 1326507024  ;;  %v743_v8 = vxor.u32 2147483648, %v2639_v43  ;;  %vm886_vm4 = vcmp.lt.s32.totalorder %v3226_v31, 2  ;;  %vm887_vm5 = vcmp.lt.s32.totalorder %v3226_v31, 3 }
 0x170   : > { %v893_v12 = vsel %vm885_vm3, %v872_v3, %v875_v34  ;;  %v747_v25 = vsel %vm745_vm1, %v746_v27, %v2639_v43  ;;  %v1658_v60 = vxor.u32 2147483648, %v1657_v28  ;;  %v816_v53 = vsub.s32 0, %v3914_v29 }
 0x171   : > { %v895_v55 = vsel %vm887_vm5, %v878_v51, %v894_v36  ;;  %v744_v49 = vsel %vm742_vm14, %v2637_v11, %v743_v8  ;;  %v890_v54 = vsel %vm888_vm2, %v878_v51, 2102212464  ;;  %v897_v13 = vsel %vm885_vm3, %v875_v34, %v878_v51 }
 0x172   : > { %v899_v26 = vsel %vm887_vm5, %v881_v33, %v898_v57  ;;  %v748_v45 = vsel %vm741_vm15, %v744_v49, %v747_v25  ;;  %v1659_v50 = vsel %vm1576_vm11, %v1658_v60, %v1657_v28  ;;  %v2346_v63 = vmin.u32 %v816_v53, %v3914_v29  ;;  %v4947_v57 = vld [vmem:[#allocation3_spill] sm:$0xff] }
 0x173   : > { %v889_v6 = vsel %vm885_vm3, %v869_v62, %v872_v3  ;;  %v749_v58 = vsel %vm739_vm0, nan, %v748_v45  ;;  %v1662_v51 = vsel %vm3854_vm10, %v2970_v20, %v1659_v50  ;;  %v896_v33 = vsel %vm886_vm4, %v893_v12, %v895_v55 }
 0x174   : > { %v901_v14 = vshll.u32 %v861_v0, 8  ;;  %2466 = vmatprep.mubr.f32.mxu0 %v749_v58  ;;  %2640 = vcosq.f32 %v1662_v51  ;;  %v818_v35 = vclz %v2346_v63  ;;  %v891_v46 = vsel %vm887_vm5, %v875_v34, %v890_v54 }
 0x175   : > { %v900_v3 = vsel %vm886_vm4, %v897_v13, %v899_v26  ;;  %2642 = vsinq.f32 %v1662_v51  ;;  %v836_v18 = vsub.s32 4, %v3901_v42  ;;  %v3958_v15 = vand.u32 31, %v3717_v44 }
 0x176   : > { %v3954_v11 = vmul.u32.u64.low %v901_v14, %v900_v3  ;;  %v3955_v62 = vmul.u32.u64.high %v901_v14, %v900_v3, %v3954_v11  ;;  %v2347_v36 = vadd.s32 4294967294, %v818_v35  ;;  %v3965_v27 = vadd.s32 1, %v3722_v7 }
 0x177   : > { %v3960_v0 = vmul.u32.u64.low %v901_v14, %v896_v33  ;;  %v3961_v43 = vmul.u32.u64.high %v901_v14, %v896_v33, %v3960_v0  ;;  %v3967_v34 = vand.u32 3, %v1663_v30  ;;  %v892_v28 = vsel %vm886_vm4, %v889_v6, %v891_v46 }
 0x178   : > { %v956_v8 = vand.u32 2147483647, %v4947_v57  ;;  %v3974_v12 = vshrl.u32 %v1886_v24, 23  ;;  %v3978_v25 = vadd.f32 %v3727_v38, %v3847_v22  ;;  %vm752_vm6 = vcmp.lt.s32.totalorder %v4937_v23, 0 }
 0x179   : > { %vm2348_vm7 = vcmp.lt.s32.totalorder %v2347_v36, 0  ;;  %v806_v7 = vadd.s32 %v3838_v37, %v3832_v9  ;;  %v3986_v31 = vsel %vm752_vm6, %v836_v18, %v3901_v42  ;;  %vm910_vm8 = vc.u32 %v3955_v62, %v3960_v0 }
 0x17a   : > { %v821_v30 = vsel %vm2348_vm7, 0, %v2347_v36  ;;  %v908_v53 = vmul.u32 %v901_v14, %v892_v28  ;;  %v911_v38 = vadd.s32 1, %v3961_v43  ;;  %vm1672_vm9 = vcmp.eq.s32.totalorder %v3967_v34, 2 }
 0x17b   : > { %v822_v24 = vsub.s32 32, %v821_v30  ;;  %v826_v60 = vsub.s32 4294967266, %v821_v30  ;;  %v3994_v22 = vand.u32 8388607, %v956_v8  ;;  %v973_v9 = vshll.u32 %v4921_v5, %v3162_v4 }
 0x17c   : > { %v974_v37 = vshrl.u32 %v4919_v19, %v3223_v56  ;;  %v977_v42 = vshrl.u32 %v4920_v17, %v3223_v56  ;;  %vm1669_vm10 = vcmp.eq.s32.totalorder %v3967_v34, 0  ;;  %v823_v55 = vshll.u32 %v3914_v29, %v821_v30 }
 0x17d   : > { %v824_v49 = vshrl.u32 %v806_v7, %v822_v24  ;;  %v827_v54 = vadd.s32 127, %v826_v60  ;;  %v912_v13 = vsel %vm910_vm8, %v911_v38, %v3961_v43  ;;  %vm1668_vm11 = vcmp.lt.s32.totalorder %v3967_v34, 2  ;;  %v4951_v60 = vld [vmem:[#allocation11_spill] sm:$0xff] }
 0x17e   : > { %v913_v26 = vadd.s32 %v912_v13, %v908_v53  ;;  %v980_v45 = vshrl.u32 %v4918_v16, %v3223_v56  ;;  %v982_v50 = vshll.u32 %v4918_v16, %v3162_v4  ;;  %v983_v63 = vshrl.u32 %v4922_v47, %v3223_v56 }
 0x17f   : > { %vm1666_vm12 = vweird.f32 %v2970_v20  ;;  %v825_v6 = vor.u32 %v824_v49, %v823_v55  ;;  %v828_v29 = vshll.u32 %v827_v54, 23  ;;  %v976_v58 = vshll.u32 %v4919_v19, %v3162_v4 }
 0x180   : > { %v986_v51 = vshrl.u32 %v4923_v59, %v3223_v56  ;;  %v914_v33 = vadd.s32 536870912, %v913_v26  ;;  %v972_v14 = vshrl.u32 %v4921_v5, %v3223_v56  ;;  %v979_v35 = vshll.u32 %v4920_v17, %v3162_v4 }
 0x181   : > { %v984_v46 = vor.u32 %v983_v63, %v982_v50  ;;  %v4948_v3 = vand.u32 2147483647, %v4937_v23  ;;  %v829_v11 = vor.u32 4788187, %v828_v29  ;;  %v975_v36 = vor.u32 %v974_v37, %v973_v9  ;;  %v2641_v7 = vpop.eup %2640 }
 0x182   : > { %v978_v43 = vor.u32 %v977_v42, %v976_v58  ;;  %v985_v28 = vshll.u32 %v4922_v47, %v3162_v4  ;;  %v832_v30 = vcvt.s32.f32 %v825_v6  ;;  %v4029_v24 = vshrl.u32 %v914_v33, 30  ;;  %v2643_v53 = vpop.eup %2642 }
 0x183   : > { %vm4023_vm13 = vcmp.le.f32.partialorder %v4948_v3, 0.7853982  ;;  %v981_v56 = vor.u32 %v980_v45, %v979_v35  ;;  %vm991_vm14 = vcmp.lt.s32.totalorder %v4951_v60, 4  ;;  %v1673_v38 = vxor.u32 2147483648, %v2641_v7 }
 0x184   : > { %v830_v55 = vand.u32 2147483647, %v829_v11  ;;  %v987_v49 = vor.u32 %v986_v51, %v985_v28  ;;  %v997_v54 = vsel %vm991_vm14, %v984_v46, 920167782  ;;  %vm1070_vm15 = vcmp.gt.s32.totalorder %v3965_v27, 0 }
 0x185   : > { %v1670_v9 = vxor.u32 2147483648, %v2643_v53  ;;  %v916_v37 = vshll.u32 %v4029_v24, 30  ;;  %v964_v4 = vor.u32 8388608, %v3994_v22  ;;  %vm988_vm0 = vcmp.lt.s32.totalorder %v4951_v60, 1 }
 0x186   : > { %v1674_v42 = vsel %vm1672_vm9, %v1673_v38, %v2643_v53  ;;  %v833_v13 = vmul.f32 %v832_v30, %v830_v55  ;;  %vm990_vm1 = vcmp.lt.s32.totalorder %v4951_v60, 3  ;;  %v996_v45 = vsel %vm988_vm0, %v975_v36, %v978_v43 }
 0x187   : > { %v1671_v50 = vsel %vm1669_vm10, %v2641_v7, %v1670_v9  ;;  %v4045_v63 = vsub.s32 %v913_v26, %v916_v37  ;;  %v998_v6 = vsel %vm990_vm1, %v981_v56, %v997_v54  ;;  %v1000_v22 = vsel %vm988_vm0, %v978_v43, %v981_v56 }
 0x188   : > { %v1675_v29 = vsel %vm1668_vm11, %v1671_v50, %v1674_v42  ;;  %v834_v58 = vxor.u32 2147483648, %v833_v13  ;;  %v993_v51 = vsel %vm991_vm14, %v981_v56, 2102212464  ;;  %v1001_v33 = vsel %vm991_vm14, %v987_v49, 1326507024  ;;  %v4952_v42 = vld [vmem:[#allocation6_spill] sm:$0xff] }
 0x189   : > { %v1676_v26 = vsel %vm1666_vm12, nan, %v1675_v29  ;;  %v919_v35 = vsub.s32 0, %v4045_v63  ;;  %vm989_vm2 = vcmp.lt.s32.totalorder %v4951_v60, 2  ;;  %v1002_v3 = vsel %vm990_vm1, %v984_v46, %v1001_v33 }
 0x18a   : > { %2479 = vmatmul.mubr.f32.gmra.mxu1 %v1676_v26  ;;  %v835_v34 = vsel %vm752_vm6, %v834_v58, %v833_v13  ;;  %v999_v11 = vsel %vm989_vm2, %v996_v45, %v998_v6  ;;  %v1003_v28 = vsel %vm989_vm2, %v1000_v22, %v1002_v3  ;;  %v1004_v7 = vshll.u32 %v964_v4, 8 }
 0x18b   : > { %v838_v20 = vsel %vm4023_vm13, %v4937_v23, %v835_v34  ;;  %v2350_v30 = vmin.u32 %v919_v35, %v4045_v63  ;;  %v992_v46 = vsel %vm988_vm0, %v972_v14, %v975_v36  ;;  %v994_v56 = vsel %vm990_vm1, %v978_v43, %v993_v51 }
 0x18c   : > { %v839_v53 = vsel %vm4023_vm13, 0, %v3986_v31  ;;  %2644 = vcosq.f32 %v838_v20  ;;  %v4080_v38 = vmul.u32.u64.low %v1004_v7, %v1003_v28  ;;  %v4081_v55 = vmul.u32.u64.high %v1004_v7, %v1003_v28, %v4080_v38 }
 0x18d   : > { %2646 = vsinq.f32 %v838_v20  ;;  %v921_v49 = vclz %v2350_v30  ;;  %v4083_v54 = vmul.u32.u64.low %v1004_v7, %v999_v11  ;;  %v4084_v9 = vmul.u32.u64.high %v1004_v7, %v999_v11, %v4083_v54 }
 0x18e   : > { %v4088_v37 = vshrl.u32 %v3348_v1, 5  ;;  %v4091_v14 = vshrl.u32 %v3717_v44, 5  ;;  %v4094_v36 = vsub.s32 32, %v3958_v15  ;;  %v995_v31 = vsel %vm989_vm2, %v992_v46, %v994_v56 }
 0x18f   : > { %v4099_v18 = vadd.s32 4294967169, %v3974_v12  ;;  %v4101_v43 = vand.u32 3, %v839_v53  ;;  %v2351_v4 = vadd.s32 4294967294, %v921_v49  ;;  %v1677_v13 = vand.u32 2147483647, %v4952_v42 }
 0x190   : > { %v4107_v1 = vsel %vm1070_vm15, %v3965_v27, 0  ;;  %v1989_v44 = vand.u32 2139095040, %v3978_v25  ;;  %vm1013_vm3 = vc.u32 %v4081_v55, %v4083_v54  ;;  %v1695_v60 = vshrl.u32 %v4919_v19, %v3712_v52 }
 0x191   : > { %v909_v12 = vadd.s32 %v3960_v0, %v3955_v62  ;;  %vm2352_vm4 = vcmp.lt.s32.totalorder %v2351_v4, 0  ;;  %v1011_v45 = vmul.u32 %v1004_v7, %v995_v31  ;;  %v1014_v50 = vadd.s32 1, %v4084_v9 }
 0x192   : > { %v924_v6 = vsel %vm2352_vm4, 0, %v2351_v4  ;;  %v1694_v27 = vshll.u32 %v4921_v5, %v3566_v40  ;;  %v1697_v22 = vshll.u32 %v4919_v19, %v3566_v40  ;;  %v1698_v29 = vshrl.u32 %v4920_v17, %v3712_v52 }
 0x193   : > { %vm848_vm5 = vcmp.eq.s32.totalorder %v4101_v43, 2  ;;  %v925_v58 = vsub.s32 32, %v924_v6  ;;  %v929_v51 = vsub.s32 4294967266, %v924_v6  ;;  %v1015_v62 = vsel %vm1013_vm3, %v1014_v50, %v4084_v9 }
 0x194   : > { %v1684_v0 = vand.u32 8388607, %v1677_v13  ;;  %vm845_vm6 = vcmp.eq.s32.totalorder %v4101_v43, 0  ;;  %v926_v33 = vshll.u32 %v4045_v63, %v924_v6  ;;  %v1016_v26 = vadd.s32 %v1015_v62, %v1011_v45 }
 0x195   : > { %v1696_v35 = vor.u32 %v1695_v60, %v1694_v27  ;;  %v1701_v3 = vshrl.u32 %v4918_v16, %v3712_v52  ;;  %vm844_vm7 = vcmp.lt.s32.totalorder %v4101_v43, 2  ;;  %v927_v34 = vshrl.u32 %v909_v12, %v925_v58 }
 0x196   : > { %v930_v11 = vadd.s32 127, %v929_v51  ;;  %v1703_v28 = vshll.u32 %v4918_v16, %v3566_v40  ;;  %v1704_v7 = vshrl.u32 %v4922_v47, %v3712_v52  ;;  %vm842_vm8 = vweird.f32 %v4937_v23 }
 0x197   : > { %v1017_v20 = vadd.s32 536870912, %v1016_v26  ;;  %v1699_v30 = vor.u32 %v1698_v29, %v1697_v22  ;;  %v1700_v63 = vshll.u32 %v4920_v17, %v3566_v40  ;;  %v1707_v46 = vshrl.u32 %v4923_v59, %v3712_v52 }
 0x198   : > { %vm855_vm9 = vcmp.lt.s32.totalorder %v4943_v39, 0  ;;  %v928_v56 = vor.u32 %v927_v34, %v926_v33  ;;  %v931_v53 = vshll.u32 %v930_v11, 23  ;;  %v1705_v38 = vor.u32 %v1704_v7, %v1703_v28 }
 0x199   : > { %v1706_v49 = vshll.u32 %v4922_v47, %v3566_v40  ;;  %v939_v9 = vsub.s32 4, %v4029_v24  ;;  %v4145_v31 = vshrl.u32 %v1017_v20, 30  ;;  %v1685_v4 = vor.u32 8388608, %v1684_v0  ;;  %v2645_v12 = vpop.eup %2644 }
 0x19a   : > { %v1702_v60 = vor.u32 %v1701_v3, %v1700_v63  ;;  %vm4149_vm10 = vcmp.le.f32.partialorder %v853_v61, 0.7853982  ;;  %v932_v50 = vor.u32 4788187, %v931_v53  ;;  %vm1709_vm11 = vcmp.lt.s32.totalorder %v4088_v37, 1  ;;  %v2647_v40 = vpop.eup %2646 }
 0x19b   : > { %v1708_v6 = vor.u32 %v1707_v46, %v1706_v49  ;;  %vm1711_vm12 = vcmp.lt.s32.totalorder %v4088_v37, 3  ;;  %v849_v27 = vxor.u32 2147483648, %v2645_v12  ;;  %v935_v22 = vcvt.s32.f32 %v928_v56 }
 0x19c   : > { %v1019_v29 = vshll.u32 %v4145_v31, 30  ;;  %vm1712_vm13 = vcmp.lt.s32.totalorder %v4088_v37, 4  ;;  %v846_v58 = vxor.u32 2147483648, %v2647_v40  ;;  %v933_v51 = vand.u32 2147483647, %v932_v50 }
 0x19d   : > { %v1717_v61 = vsel %vm1709_vm11, %v1696_v35, %v1699_v30  ;;  %v1718_v62 = vsel %vm1712_vm13, %v1705_v38, 920167782  ;;  %v850_v0 = vsel %vm848_vm5, %v849_v27, %v2647_v40  ;;  %v1693_v3 = vshrl.u32 %v4921_v5, %v3712_v52 }
 0x19e   : > { %v4163_v33 = vsub.s32 %v1016_v26, %v1019_v29  ;;  %v1719_v34 = vsel %vm1711_vm12, %v1702_v60, %v1718_v62  ;;  %v847_v11 = vsel %vm845_vm6, %v2645_v12, %v846_v58  ;;  %v936_v28 = vmul.f32 %v935_v22, %v933_v51 }
 0x19f   : > { %vm1710_vm14 = vcmp.lt.s32.totalorder %v4088_v37, 2  ;;  %v1714_v7 = vsel %vm1712_vm13, %v1702_v60, 2102212464  ;;  %v851_v20 = vsel %vm844_vm7, %v847_v11, %v850_v0  ;;  %v1721_v63 = vsel %vm1709_vm11, %v1699_v30, %v1702_v60 }
 0x1a0   : > { %v1022_v26 = vsub.s32 0, %v4163_v33  ;;  %v1720_v52 = vsel %vm1710_vm14, %v1717_v61, %v1719_v34  ;;  %v852_v46 = vsel %vm842_vm8, nan, %v851_v20  ;;  %v937_v56 = vxor.u32 2147483648, %v936_v28 }
 0x1a1   : > { %v1722_v53 = vsel %vm1712_vm13, %v1708_v6, 1326507024  ;;  %v1725_v49 = vshll.u32 %v1685_v4, 8  ;;  %2467 = vmatmul.mubr.f32.gmra.mxu0 %v852_v46  ;;  %v940_v43 = vsel %vm855_vm9, %v939_v9, %v4029_v24  ;;  %v1713_v50 = vsel %vm1709_vm11, %v1693_v3, %v1696_v35 }
 0x1a2   : > { %v2354_v12 = vmin.u32 %v1022_v26, %v4163_v33  ;;  %v1715_v60 = vsel %vm1711_vm12, %v1699_v30, %v1714_v7  ;;  %v938_v23 = vsel %vm855_vm9, %v937_v56, %v936_v28  ;;  %v1723_v6 = vsel %vm1711_vm12, %v1705_v38, %v1722_v53 }
 0x1a3   : > { %v4197_v4 = vmul.u32.u64.low %v1725_v49, %v1720_v52  ;;  %v4198_v40 = vmul.u32.u64.high %v1725_v49, %v1720_v52, %v4197_v4  ;;  %v941_v24 = vsel %vm4149_vm10, %v4943_v39, %v938_v23  ;;  %v1042_v35 = vsub.s32 4, %v4145_v31 }
 0x1a4   : > { %v1024_v9 = vclz %v2354_v12  ;;  %v1724_v30 = vsel %vm1710_vm14, %v1721_v63, %v1723_v6  ;;  %v942_v27 = vsel %vm4149_vm10, 0, %v940_v43  ;;  %2648 = vcosq.f32 %v941_v24 }
 0x1a5   : > { %v4209_v22 = vmul.u32.u64.low %v1725_v49, %v1724_v30  ;;  %v4210_v38 = vmul.u32.u64.high %v1725_v49, %v1724_v30, %v4209_v22  ;;  %v4213_v29 = vshrl.u32 %v4107_v1, 5  ;;  %2650 = vsinq.f32 %v941_v24 }
 0x1a6   : > { %v2355_v58 = vadd.s32 4294967294, %v1024_v9  ;;  %v1716_v51 = vsel %vm1710_vm14, %v1713_v50, %v1715_v60  ;;  %v4218_v61 = vand.u32 31, %v4107_v1  ;;  %v1990_v62 = vshrl.u32 %v1989_v44, 23 }
 0x1a7   : > { %vm958_vm15 = vcmp.lt.s32.totalorder %v4947_v57, 0  ;;  %v1735_v45 = vadd.s32 1, %v4198_v40  ;;  %v4224_v0 = vand.u32 3, %v942_v27  ;;  %vm4228_vm0 = vcmp.le.f32.partialorder %v956_v8, 0.7853982 }
 0x1a8   : > { %vm2356_vm1 = vcmp.lt.s32.totalorder %v2355_v58, 0  ;;  %v4235_v37 = vsel %vm958_vm15, %v1042_v35, %v4145_v31  ;;  %v1012_v1 = vadd.s32 %v4083_v54, %v4081_v55  ;;  %v1732_v34 = vmul.u32 %v1725_v49, %v1716_v51 }
 0x1a9   : > { %v1027_v44 = vsel %vm2356_vm1, 0, %v2355_v58  ;;  %vm1734_vm2 = vc.u32 %v4210_v38, %v4197_v4  ;;  %v1780_v7 = vand.u32 2147483647, %v3216_v32  ;;  %v4243_v20 = vadd.s32 4294967169, %v1990_v62 }
 0x1aa   : > { %v1028_v11 = vsub.s32 32, %v1027_v44  ;;  %v1032_v28 = vsub.s32 4294967266, %v1027_v44  ;;  %v1736_v8 = vsel %vm1734_vm2, %v1735_v45, %v4198_v40  ;;  %v1045_v31 = vsel %vm4228_vm0, 0, %v4235_v37 }
 0x1ab   : > { %v1737_v26 = vadd.s32 %v1736_v8, %v1732_v34  ;;  %v1798_v55 = vshrl.u32 %v4919_v19, %v4094_v36  ;;  %vm951_vm3 = vcmp.eq.s32.totalorder %v4224_v0, 2  ;;  %v1029_v54 = vshll.u32 %v4163_v33, %v1027_v44 }
 0x1ac   : > { %v1030_v52 = vshrl.u32 %v1012_v1, %v1028_v11  ;;  %v1033_v63 = vadd.s32 127, %v1032_v28  ;;  %v1801_v46 = vshrl.u32 %v4920_v17, %v4094_v36  ;;  %vm948_vm4 = vcmp.eq.s32.totalorder %v4224_v0, 0 }
 0x1ad   : > { %v1738_v56 = vadd.s32 536870912, %v1737_v26  ;;  %v1804_v53 = vshrl.u32 %v4918_v16, %v4094_v36  ;;  %v1806_v49 = vshll.u32 %v4918_v16, %v3958_v15  ;;  %v1807_v43 = vshrl.u32 %v4922_v47, %v4094_v36 }
 0x1ae   : > { %vm947_vm5 = vcmp.lt.s32.totalorder %v4224_v0, 2  ;;  %v1031_v33 = vor.u32 %v1030_v52, %v1029_v54  ;;  %v1034_v12 = vshll.u32 %v1033_v63, 23  ;;  %v1787_v50 = vand.u32 8388607, %v1780_v7 }
 0x1af   : > { %v1797_v60 = vshll.u32 %v4921_v5, %v3958_v15  ;;  %vm945_vm6 = vweird.f32 %v4943_v39  ;;  %v1739_v23 = vshrl.u32 %v1738_v56, 30  ;;  %v1800_v6 = vshll.u32 %v4919_v19, %v3958_v15 }
 0x1b0   : > { %v1803_v40 = vshll.u32 %v4920_v17, %v3958_v15  ;;  %v1808_v24 = vor.u32 %v1807_v43, %v1806_v49  ;;  %v1035_v9 = vor.u32 4788187, %v1034_v12  ;;  %v1796_v35 = vshrl.u32 %v4921_v5, %v4094_v36 }
 0x1b1   : > { %v1799_v30 = vor.u32 %v1798_v55, %v1797_v60  ;;  %v1810_v27 = vshrl.u32 %v4923_v59, %v4094_v36  ;;  %v1740_v22 = vshll.u32 %v1739_v23, 30  ;;  %v1802_v58 = vor.u32 %v1801_v46, %v1800_v6  ;;  %v2649_v62 = vpop.eup %2648 }
 0x1b2   : > { %v1805_v51 = vor.u32 %v1804_v53, %v1803_v40  ;;  %vm1815_vm7 = vcmp.lt.s32.totalorder %v4091_v14, 4  ;;  %v1036_v45 = vand.u32 2147483647, %v1035_v9  ;;  %v1038_v1 = vcvt.s32.f32 %v1031_v33  ;;  %v2651_v11 = vpop.eup %2650 }
 0x1b3   : > { %v1809_v44 = vshll.u32 %v4922_v47, %v3958_v15  ;;  %v1821_v34 = vsel %vm1815_vm7, %v1808_v24, 920167782  ;;  %v952_v28 = vxor.u32 2147483648, %v2649_v62  ;;  %v4280_v8 = vsub.s32 %v1737_v26, %v1740_v22 }
 0x1b4   : > { %v1788_v55 = vor.u32 8388608, %v1787_v50  ;;  %vm1812_vm8 = vcmp.lt.s32.totalorder %v4091_v14, 1  ;;  %v949_v36 = vxor.u32 2147483648, %v2651_v11  ;;  %v1039_v54 = vmul.f32 %v1038_v1, %v1036_v45 }
 0x1b5   : > { %v1811_v52 = vor.u32 %v1810_v27, %v1809_v44  ;;  %vm1814_vm9 = vcmp.lt.s32.totalorder %v4091_v14, 3  ;;  %v953_v63 = vsel %vm951_vm3, %v952_v28, %v2651_v11  ;;  %v1743_v15 = vsub.s32 0, %v4280_v8 }
 0x1b6   : > { %v1820_v46 = vsel %vm1812_vm8, %v1799_v30, %v1802_v58  ;;  %v1822_v26 = vsel %vm1814_vm9, %v1805_v51, %v1821_v34  ;;  %v950_v56 = vsel %vm948_vm4, %v2649_v62, %v949_v36  ;;  %v1040_v53 = vxor.u32 2147483648, %v1039_v54 }
 0x1b7   : > { %v1763_v49 = vsub.s32 4, %v1739_v23  ;;  %vm1813_vm10 = vcmp.lt.s32.totalorder %v4091_v14, 2  ;;  %v954_v43 = vsel %vm947_vm5, %v950_v56, %v953_v63  ;;  %v2382_v33 = vmin.u32 %v1743_v15, %v4280_v8 }
 0x1b8   : > { %v1817_v12 = vsel %vm1815_vm7, %v1805_v51, 2102212464  ;;  %v1824_v50 = vsel %vm1812_vm8, %v1802_v58, %v1805_v51  ;;  %v955_v60 = vsel %vm945_vm6, nan, %v954_v43  ;;  %v1041_v6 = vsel %vm958_vm15, %v1040_v53, %v1039_v54 }
 0x1b9   : > { %v1823_v40 = vsel %vm1813_vm10, %v1820_v46, %v1822_v26  ;;  %v1825_v0 = vsel %vm1815_vm7, %v1811_v52, 1326507024  ;;  %2469 = vmatprep.mubr.f32.mxu0 %v955_v60  ;;  %v1044_v9 = vsel %vm4228_vm0, %v4947_v57, %v1041_v6  ;;  %v1745_v27 = vclz %v2382_v33 }
 0x1ba   : > { %v1826_v22 = vsel %vm1814_vm9, %v1808_v24, %v1825_v0  ;;  %v1828_v39 = vshll.u32 %v1788_v55, 8  ;;  %2652 = vcosq.f32 %v1044_v9  ;;  %v1816_v51 = vsel %vm1812_vm8, %v1796_v35, %v1799_v30 }
 0x1bb   : > { %v1818_v62 = vsel %vm1814_vm9, %v1802_v58, %v1817_v12  ;;  %v1827_v45 = vsel %vm1813_vm10, %v1824_v50, %v1826_v22  ;;  %2654 = vsinq.f32 %v1044_v9  ;;  %v2383_v1 = vadd.s32 4294967294, %v1745_v27 }
 0x1bc   : > { %v4320_v44 = vmul.u32.u64.low %v1828_v39, %v1827_v45  ;;  %v4321_v34 = vmul.u32.u64.high %v1828_v39, %v1827_v45, %v4320_v44  ;;  %v4327_v24 = vand.u32 3, %v1045_v31  ;;  %vm1679_vm11 = vcmp.lt.s32.totalorder %v4952_v42, 0 }
 0x1bd   : > { %v4330_v35 = vmul.u32.u64.low %v1828_v39, %v1823_v40  ;;  %v4331_v30 = vmul.u32.u64.high %v1828_v39, %v1823_v40, %v4330_v35  ;;  %vm2384_vm12 = vcmp.lt.s32.totalorder %v2383_v1, 0  ;;  %v4336_v58 = vsel %vm1679_vm11, %v1763_v49, %v1739_v23 }
 0x1be   : > { %v1819_v11 = vsel %vm1813_vm10, %v1816_v51, %v1818_v62  ;;  %v1059_v3 = vand.u32 2147483647, %v3357_v48  ;;  %v1074_v37 = vsub.s32 32, %v4218_v61  ;;  %v4343_v31 = vadd.s32 1, %v4099_v18 }
 0x1bf   : > { %v4346_v28 = vadd.s32 1, %v4243_v20  ;;  %v1748_v55 = vsel %vm2384_vm12, 0, %v2383_v1  ;;  %vm4350_vm13 = vcmp.le.f32.partialorder %v1677_v13, 0.7853982  ;;  %v1733_v14 = vadd.s32 %v4197_v4, %v4210_v38 }
 0x1c0   : > { %v1749_v23 = vsub.s32 32, %v1748_v55  ;;  %v1753_v54 = vsub.s32 4294967266, %v1748_v55  ;;  %v1766_v18 = vsel %vm4350_vm13, 0, %v4336_v58  ;;  %v1835_v52 = vmul.u32 %v1828_v39, %v1819_v11 }
 0x1c1   : > { %vm1837_vm14 = vc.u32 %v4321_v34, %v4330_v35  ;;  %v1838_v20 = vadd.s32 1, %v4331_v30  ;;  %vm1054_vm15 = vcmp.eq.s32.totalorder %v4327_v24, 2  ;;  %v1750_v13 = vshll.u32 %v4280_v8, %v1748_v55 }
 0x1c2   : > { %v1751_v63 = vshrl.u32 %v1733_v14, %v1749_v23  ;;  %v1754_v15 = vadd.s32 127, %v1753_v54  ;;  %v4366_v4 = vand.u32 8388607, %v1059_v3  ;;  %vm1051_vm0 = vcmp.eq.s32.totalorder %v4327_v24, 0 }
 0x1c3   : > { %v1839_v38 = vsel %vm1837_vm14, %v1838_v20, %v4331_v30  ;;  %v1077_v46 = vshrl.u32 %v4919_v19, %v1074_v37  ;;  %v1083_v26 = vshrl.u32 %v4918_v16, %v1074_v37  ;;  %v1086_v56 = vshrl.u32 %v4922_v47, %v1074_v37 }
 0x1c4   : > { %vm1050_vm1 = vcmp.lt.s32.totalorder %v4327_v24, 2  ;;  %v1752_v53 = vor.u32 %v1751_v63, %v1750_v13  ;;  %v1755_v8 = vshll.u32 %v1754_v15, 23  ;;  %v1840_v49 = vadd.s32 %v1839_v38, %v1835_v52 }
 0x1c5   : > { %v1085_v43 = vshll.u32 %v4918_v16, %v4218_v61  ;;  %vm1048_vm2 = vweird.f32 %v4947_v57  ;;  %v1075_v33 = vshrl.u32 %v4921_v5, %v1074_v37  ;;  %v1076_v12 = vshll.u32 %v4921_v5, %v4218_v61 }
 0x1c6   : > { %v1080_v50 = vshrl.u32 %v4920_v17, %v1074_v37  ;;  %v1089_v60 = vshrl.u32 %v4923_v59, %v1074_v37  ;;  %vm1894_vm3 = vcmp.gt.s32.totalorder %v4343_v31, 0  ;;  %v1756_v6 = vor.u32 4788187, %v1755_v8 }
 0x1c7   : > { %v1841_v40 = vadd.s32 536870912, %v1840_v49  ;;  %v1082_v0 = vshll.u32 %v4920_v17, %v4218_v61  ;;  %v1087_v9 = vor.u32 %v1086_v56, %v1085_v43  ;;  %v1067_v27 = vor.u32 8388608, %v4366_v4  ;;  %v2653_v62 = vpop.eup %2652 }
 0x1c8   : > { %v1078_v22 = vor.u32 %v1077_v46, %v1076_v12  ;;  %v1079_v39 = vshll.u32 %v4919_v19, %v4218_v61  ;;  %v1088_v51 = vshll.u32 %v4922_v47, %v4218_v61  ;;  %v1757_v45 = vand.u32 2147483647, %v1756_v6  ;;  %v2655_v11 = vpop.eup %2654 }
 0x1c9   : > { %v1759_v1 = vcvt.s32.f32 %v1752_v53  ;;  %v4390_v44 = vshrl.u32 %v1841_v40, 30  ;;  %v1084_v30 = vor.u32 %v1083_v26, %v1082_v0  ;;  %v1055_v37 = vxor.u32 2147483648, %v2653_v62 }
 0x1ca   : > { %v1081_v55 = vor.u32 %v1080_v50, %v1079_v39  ;;  %v1090_v14 = vor.u32 %v1089_v60, %v1088_v51  ;;  %vm1094_vm4 = vcmp.lt.s32.totalorder %v4213_v29, 4  ;;  %v1052_v23 = vxor.u32 2147483648, %v2655_v11  ;;  %v4959_v51 = vld [vmem:[#allocation5_spill] sm:$0xff] }
 0x1cb   : > { %v1760_v54 = vmul.f32 %v1759_v1, %v1757_v45  ;;  %v1843_v52 = vshll.u32 %v4390_v44, 30  ;;  %v1100_v20 = vsel %vm1094_vm4, %v1087_v9, 920167782  ;;  %v1056_v61 = vsel %vm1054_vm15, %v1055_v37, %v2655_v11 }
 0x1cc   : > { %vm1091_vm5 = vcmp.lt.s32.totalorder %v4213_v29, 1  ;;  %vm1092_vm6 = vcmp.lt.s32.totalorder %v4213_v29, 2  ;;  %vm1093_vm7 = vcmp.lt.s32.totalorder %v4213_v29, 3  ;;  %v1053_v13 = vsel %vm1051_vm0, %v2653_v62, %v1052_v23 }
 0x1cd   : > { %v1761_v63 = vxor.u32 2147483648, %v1760_v54  ;;  %v4403_v15 = vsub.s32 %v1840_v49, %v1843_v52  ;;  %v1096_v4 = vsel %vm1094_vm4, %v1084_v30, 2102212464  ;;  %v1057_v38 = vsel %vm1050_vm1, %v1053_v13, %v1056_v61 }
 0x1ce   : > { %v1099_v46 = vsel %vm1091_vm5, %v1078_v22, %v1081_v55  ;;  %v1101_v26 = vsel %vm1093_vm7, %v1084_v30, %v1100_v20  ;;  %v1104_v56 = vsel %vm1094_vm4, %v1090_v14, 1326507024  ;;  %v1058_v53 = vsel %vm1048_vm2, nan, %v1057_v38 }
 0x1cf   : > { %v1762_v8 = vsel %vm1679_vm11, %v1761_v63, %v1760_v54  ;;  %v1846_v49 = vsub.s32 0, %v4403_v15  ;;  %v1103_v24 = vsel %vm1091_vm5, %v1081_v55, %v1084_v30  ;;  %2470 = vmatmul.mubr.f32.gmra.mxu0 %v1058_v53  ;;  %v1095_v12 = vsel %vm1091_vm5, %v1075_v33, %v1078_v22 }
 0x1d0   : > { %v1765_v43 = vsel %vm4350_vm13, %v4952_v42, %v1762_v8  ;;  %v1097_v57 = vsel %vm1093_vm7, %v1081_v55, %v1096_v4  ;;  %v1105_v50 = vsel %vm1093_vm7, %v1087_v9, %v1104_v56  ;;  %v1102_v6 = vsel %vm1092_vm6, %v1099_v46, %v1101_v26 }
 0x1d1   : > { %2656 = vcosq.f32 %v1765_v43  ;;  %v2386_v60 = vmin.u32 %v1846_v49, %v4403_v15  ;;  %v1107_v40 = vshll.u32 %v1067_v27, 8  ;;  %v4437_v0 = vsel %vm1894_vm3, %v4343_v31, 0 }
 0x1d2   : > { %vm1997_vm8 = vcmp.gt.s32.totalorder %v4346_v28, 0  ;;  %2658 = vsinq.f32 %v1765_v43  ;;  %v1106_v33 = vsel %vm1092_vm6, %v1103_v24, %v1105_v50  ;;  %v1162_v62 = vand.u32 2147483647, %v4959_v51 }
 0x1d3   : > { %v1848_v22 = vclz %v2386_v60  ;;  %v4442_v9 = vmul.u32.u64.low %v1107_v40, %v1106_v33  ;;  %v4443_v39 = vmul.u32.u64.high %v1107_v40, %v1106_v33, %v4442_v9  ;;  %v4450_v27 = vand.u32 3, %v1766_v18 }
 0x1d4   : > { %v1098_v31 = vsel %vm1092_vm6, %v1095_v12, %v1097_v57  ;;  %v4454_v45 = vmul.u32.u64.low %v1107_v40, %v1102_v6  ;;  %v4455_v1 = vmul.u32.u64.high %v1107_v40, %v1102_v6, %v4454_v45  ;;  %v4459_v30 = vshrl.u32 %v3343_v21, 5 }
 0x1d5   : > { %v2387_v11 = vadd.s32 4294967294, %v1848_v22  ;;  %v4462_v37 = vand.u32 31, %v4437_v0  ;;  %v4465_v36 = vsel %vm1997_vm8, %v4346_v28, 0  ;;  %v1836_v58 = vadd.s32 %v4330_v35, %v4321_v34 }
 0x1d6   : > { %v1866_v29 = vsub.s32 4, %v4390_v44  ;;  %v1114_v18 = vmul.u32 %v1107_v40, %v1098_v31  ;;  %vm1116_vm10 = vc.u32 %v4443_v39, %v4454_v45  ;;  %v4474_v21 = vand.u32 8388607, %v1162_v62 }
 0x1d7   : > { %vm2388_vm9 = vcmp.lt.s32.totalorder %v2387_v11, 0  ;;  %vm1775_vm11 = vcmp.eq.s32.totalorder %v4450_v27, 2  ;;  %v1117_v28 = vadd.s32 1, %v4455_v1  ;;  %v1179_v14 = vshll.u32 %v4921_v5, %v3563_v2 }
 0x1d8   : > { %v1851_v55 = vsel %vm2388_vm9, 0, %v2387_v11  ;;  %v1180_v34 = vshrl.u32 %v4919_v19, %v3705_v41  ;;  %vm1772_vm12 = vcmp.eq.s32.totalorder %v4450_v27, 0  ;;  %v1182_v54 = vshll.u32 %v4919_v19, %v3563_v2 }
 0x1d9   : > { %v1852_v35 = vsub.s32 32, %v1851_v55  ;;  %v1856_v23 = vsub.s32 4294967266, %v1851_v55  ;;  %v1183_v52 = vshrl.u32 %v4920_v17, %v3705_v41  ;;  %vm1771_vm13 = vcmp.lt.s32.totalorder %v4450_v27, 2 }
 0x1da   : > { %v1118_v20 = vsel %vm1116_vm10, %v1117_v28, %v4455_v1  ;;  %v1186_v61 = vshrl.u32 %v4918_v16, %v3705_v41  ;;  %v1188_v13 = vshll.u32 %v4918_v16, %v3563_v2  ;;  %v1189_v63 = vshrl.u32 %v4922_v47, %v3705_v41 }
 0x1db   : > { %vm1769_vm14 = vweird.f32 %v4952_v42  ;;  %vm1782_vm15 = vcmp.lt.s32.totalorder %v3216_v32, 0  ;;  %v1853_v4 = vshll.u32 %v4403_v15, %v1851_v55  ;;  %v1854_v38 = vshrl.u32 %v1836_v58, %v1852_v35 }
 0x1dc   : > { %v1857_v46 = vadd.s32 127, %v1856_v23  ;;  %v1119_v26 = vadd.s32 %v1118_v20, %v1114_v18  ;;  %v1185_v56 = vshll.u32 %v4920_v17, %v3563_v2  ;;  %v1190_v53 = vor.u32 %v1189_v63, %v1188_v13 }
 0x1dd   : > { %v1191_v8 = vshll.u32 %v4922_v47, %v3563_v2  ;;  %v1192_v49 = vshrl.u32 %v4923_v59, %v3705_v41  ;;  %v1855_v24 = vor.u32 %v1854_v38, %v1853_v4  ;;  %v1170_v57 = vor.u32 8388608, %v4474_v21 }
 0x1de   : > { %v1858_v43 = vshll.u32 %v1857_v46, 23  ;;  %v1120_v12 = vadd.s32 536870912, %v1119_v26  ;;  %v2657_v50 = vpop.eup %2656  ;;  %v1181_v15 = vor.u32 %v1180_v34, %v1179_v14  ;;  %v1184_v60 = vor.u32 %v1183_v52, %v1182_v54 }
 0x1df   : > { %v1187_v6 = vor.u32 %v1186_v61, %v1185_v56  ;;  %v1193_v40 = vor.u32 %v1192_v49, %v1191_v8  ;;  %v2659_v33 = vpop.eup %2658  ;;  %v1776_v22 = vxor.u32 2147483648, %v2657_v50  ;;  %vm1197_vm0 = vcmp.lt.s32.totalorder %v4459_v30, 4 }
 0x1e0   : > { %v1859_v9 = vor.u32 4788187, %v1858_v43  ;;  %v1121_v31 = vshrl.u32 %v1120_v12, 30  ;;  %v1773_v2 = vxor.u32 2147483648, %v2659_v33  ;;  %vm1194_vm1 = vcmp.lt.s32.totalorder %v4459_v30, 1 }
 0x1e1   : > { %vm1196_vm2 = vcmp.lt.s32.totalorder %v4459_v30, 3  ;;  %v1203_v1 = vsel %vm1197_vm0, %v1190_v53, 920167782  ;;  %v1777_v11 = vsel %vm1775_vm11, %v1776_v22, %v2659_v33  ;;  %v1862_v18 = vcvt.s32.f32 %v1855_v24 }
 0x1e2   : > { %v1860_v58 = vand.u32 2147483647, %v1859_v9  ;;  %v1122_v21 = vshll.u32 %v1121_v31, 30  ;;  %v1774_v55 = vsel %vm1772_vm12, %v2657_v50, %v1773_v2  ;;  %v1202_v28 = vsel %vm1194_vm1, %v1181_v15, %v1184_v60 }
 0x1e3   : > { %v1206_v14 = vsel %vm1194_vm1, %v1184_v60, %v1187_v6  ;;  %v1207_v34 = vsel %vm1197_vm0, %v1193_v40, 1326507024  ;;  %v1778_v35 = vsel %vm1771_vm13, %v1774_v55, %v1777_v11  ;;  %v1204_v52 = vsel %vm1196_vm2, %v1187_v6, %v1203_v1 }
 0x1e4   : > { %v1863_v23 = vmul.f32 %v1862_v18, %v1860_v58  ;;  %v4522_v54 = vsub.s32 %v1119_v26, %v1122_v21  ;;  %v1779_v20 = vsel %vm1769_vm14, nan, %v1778_v35  ;;  %v1867_v61 = vsel %vm1782_vm15, %v1866_v29, %v4390_v44 }
 0x1e5   : > { %v1178_v13 = vshrl.u32 %v4921_v5, %v3705_v41  ;;  %vm1195_vm3 = vcmp.lt.s32.totalorder %v4459_v30, 2  ;;  %2481 = vmatprep.mubr.f32.mxu1 %v1779_v20  ;;  %v1199_v4 = vsel %vm1197_vm0, %v1187_v6, 2102212464  ;;  %v1208_v42 = vsel %vm1196_vm2, %v1190_v53, %v1207_v34 }
 0x1e6   : > { %v1864_v27 = vxor.u32 2147483648, %v1863_v23  ;;  %v1125_v63 = vsub.s32 0, %v4522_v54  ;;  %vm4543_vm4 = vcmp.le.f32.partialorder %v1780_v7, 0.7853982  ;;  %v1205_v41 = vsel %vm1195_vm3, %v1202_v28, %v1204_v52 }
 0x1e7   : > { %v1209_v44 = vsel %vm1195_vm3, %v1206_v14, %v1208_v42  ;;  %v1210_v29 = vshll.u32 %v1170_v57, 8  ;;  %v1869_v26 = vsel %vm4543_vm4, 0, %v1867_v61  ;;  %v1198_v7 = vsel %vm1194_vm1, %v1178_v13, %v1181_v15 }
 0x1e8   : > { %v1865_v46 = vsel %vm1782_vm15, %v1864_v27, %v1863_v23  ;;  %v2358_v56 = vmin.u32 %v1125_v63, %v4522_v54  ;;  %v1200_v8 = vsel %vm1196_vm2, %v1184_v60, %v1199_v4  ;;  %v1145_v50 = vsub.s32 4, %v1121_v31 }
 0x1e9   : > { %v1868_v53 = vsel %vm4543_vm4, %v3216_v32, %v1865_v46  ;;  %v4563_v49 = vmul.u32.u64.low %v1210_v29, %v1209_v44  ;;  %v4564_v24 = vmul.u32.u64.high %v1210_v29, %v1209_v44, %v4563_v49  ;;  %v1883_v15 = vand.u32 2147483647, %v3731_v10 }
 0x1ea   : > { %2660 = vcosq.f32 %v1868_v53  ;;  %v1127_v43 = vclz %v2358_v56  ;;  %v4566_v12 = vmul.u32.u64.low %v1210_v29, %v1205_v41  ;;  %v4567_v57 = vmul.u32.u64.high %v1210_v29, %v1205_v41, %v4566_v12 }
 0x1eb   : > { %2662 = vsinq.f32 %v1868_v53  ;;  %v1898_v6 = vsub.s32 32, %v4462_v37  ;;  %v1201_v33 = vsel %vm1195_vm3, %v1198_v7, %v1200_v8  ;;  %v4575_v60 = vshrl.u32 %v4437_v0, 5 }
 0x1ec   : > { %v2359_v40 = vadd.s32 4294967294, %v1127_v43  ;;  %v4578_v22 = vand.u32 31, %v4465_v36  ;;  %v4580_v9 = vand.u32 3, %v1869_v26  ;;  %vm1219_vm5 = vc.u32 %v4564_v24, %v4566_v12 }
 0x1ed   : > { %vm1061_vm6 = vcmp.lt.s32.totalorder %v3357_v48, 0  ;;  %v1115_v2 = vadd.s32 %v4454_v45, %v4443_v39  ;;  %v1220_v30 = vadd.s32 1, %v4567_v57  ;;  %v1217_v11 = vmul.u32 %v1210_v29, %v1201_v33 }
 0x1ee   : > { %vm2360_vm7 = vcmp.lt.s32.totalorder %v2359_v40, 0  ;;  %v4590_v0 = vsel %vm1061_vm6, %v1145_v50, %v1121_v31  ;;  %v4594_v58 = vand.u32 8388607, %v1883_v15  ;;  %v1901_v28 = vshrl.u32 %v4919_v19, %v1898_v6 }
 0x1ef   : > { %v1130_v1 = vsel %vm2360_vm7, 0, %v2359_v40  ;;  %v1221_v55 = vsel %vm1219_vm5, %v1220_v30, %v4567_v57  ;;  %vm1878_vm8 = vcmp.eq.s32.totalorder %v4580_v9, 2  ;;  %v1904_v14 = vshrl.u32 %v4920_v17, %v1898_v6 }
 0x1f0   : > { %v1131_v18 = vsub.s32 32, %v1130_v1  ;;  %v1135_v21 = vsub.s32 4294967266, %v1130_v1  ;;  %v1132_v39 = vshll.u32 %v4522_v54, %v1130_v1  ;;  %v1222_v45 = vadd.s32 %v1221_v55, %v1217_v11 }
 0x1f1   : > { %v1907_v31 = vshrl.u32 %v4918_v16, %v1898_v6  ;;  %vm1875_vm9 = vcmp.eq.s32.totalorder %v4580_v9, 0  ;;  %v1909_v23 = vshll.u32 %v4918_v16, %v4462_v37  ;;  %v1910_v52 = vshrl.u32 %v4922_v47, %v1898_v6 }
 0x1f2   : > { %v1133_v34 = vshrl.u32 %v1115_v2, %v1131_v18  ;;  %v1136_v35 = vadd.s32 127, %v1135_v21  ;;  %vm1874_vm10 = vcmp.lt.s32.totalorder %v4580_v9, 2  ;;  %v1223_v20 = vadd.s32 536870912, %v1222_v45 }
 0x1f3   : > { %v1900_v54 = vshll.u32 %v4921_v5, %v4462_v37  ;;  %v1906_v61 = vshll.u32 %v4920_v17, %v4462_v37  ;;  %v1913_v13 = vshrl.u32 %v4923_v59, %v1898_v6  ;;  %vm1872_vm11 = vweird.f32 %v3216_v32 }
 0x1f4   : > { %v1134_v27 = vor.u32 %v1133_v34, %v1132_v39  ;;  %v1137_v63 = vshll.u32 %v1136_v35, 23  ;;  %v1903_v4 = vshll.u32 %v4919_v19, %v4462_v37  ;;  %v1911_v42 = vor.u32 %v1910_v52, %v1909_v23 }
 0x1f5   : > { %v4615_v38 = vshrl.u32 %v1223_v20, 30  ;;  %v1899_v41 = vshrl.u32 %v4921_v5, %v1898_v6  ;;  %v1908_v44 = vor.u32 %v1907_v31, %v1906_v61  ;;  %v1912_v29 = vshll.u32 %v4922_v47, %v4462_v37 }
 0x1f6   : > { %vm4622_vm12 = vcmp.le.f32.partialorder %v1059_v3, 0.7853982  ;;  %v1138_v26 = vor.u32 4788187, %v1137_v63  ;;  %v1902_v56 = vor.u32 %v1901_v28, %v1900_v54  ;;  %v1905_v7 = vor.u32 %v1904_v14, %v1903_v4 }
 0x1f7   : > { %vm1918_vm13 = vcmp.lt.s32.totalorder %v4575_v60, 4  ;;  %v2661_v53 = vpop.eup %2660  ;;  %v1225_v8 = vshll.u32 %v4615_v38, 30  ;;  %v1891_v49 = vor.u32 8388608, %v4594_v58  ;;  %v1914_v43 = vor.u32 %v1913_v13, %v1912_v29 }
 0x1f8   : > { %v1924_v37 = vsel %vm1918_vm13, %v1911_v42, 920167782  ;;  %v2663_v57 = vpop.eup %2662  ;;  %v1879_v50 = vxor.u32 2147483648, %v2661_v53  ;;  %v1139_v3 = vand.u32 2147483647, %v1138_v26  ;;  %v1141_v6 = vcvt.s32.f32 %v1134_v27 }
 0x1f9   : > { %vm1915_vm14 = vcmp.lt.s32.totalorder %v4575_v60, 1  ;;  %v1876_v40 = vxor.u32 2147483648, %v2663_v57  ;;  %v4632_v33 = vsub.s32 %v1222_v45, %v1225_v8  ;;  %vm1917_vm15 = vcmp.lt.s32.totalorder %v4575_v60, 3 }
 0x1fa   : > { %v1920_v2 = vsel %vm1918_vm13, %v1908_v44, 2102212464  ;;  %v1880_v30 = vsel %vm1878_vm8, %v1879_v50, %v2663_v57  ;;  %v1142_v1 = vmul.f32 %v1141_v6, %v1139_v3  ;;  %v1923_v11 = vsel %vm1915_vm14, %v1902_v56, %v1905_v7 }
 0x1fb   : > { %v1925_v58 = vsel %vm1917_vm15, %v1908_v44, %v1924_v37  ;;  %v1877_v18 = vsel %vm1875_vm9, %v2661_v53, %v1876_v40  ;;  %v1228_v21 = vsub.s32 0, %v4632_v33  ;;  %v1927_v55 = vsel %vm1915_vm14, %v1905_v7, %v1908_v44 }
 0x1fc   : > { %v1928_v28 = vsel %vm1918_vm13, %v1914_v43, 1326507024  ;;  %v1881_v39 = vsel %vm1874_vm10, %v1877_v18, %v1880_v30  ;;  %v1143_v45 = vxor.u32 2147483648, %v1142_v1  ;;  %vm1916_vm0 = vcmp.lt.s32.totalorder %v4575_v60, 2 }
 0x1fd   : > { %v1929_v14 = vsel %vm1917_vm15, %v1911_v42, %v1928_v28  ;;  %v1882_v31 = vsel %vm1872_vm11, nan, %v1881_v39  ;;  %v2362_v34 = vmin.u32 %v1228_v21, %v4632_v33  ;;  %v1926_v35 = vsel %vm1916_vm0, %v1923_v11, %v1925_v58 }
 0x1fe   : > { %v1931_v23 = vshll.u32 %v1891_v49, 8  ;;  %2482 = vmatmul.mubr.f32.gmra.mxu1 %v1882_v31  ;;  %v1144_v9 = vsel %vm1061_vm6, %v1143_v45, %v1142_v1  ;;  %v1919_v52 = vsel %vm1915_vm14, %v1899_v41, %v1902_v56  ;;  %v1921_v20 = vsel %vm1917_vm15, %v1905_v7, %v1920_v2 }
 0x1ff   : > { %v1930_v32 = vsel %vm1916_vm0, %v1927_v55, %v1929_v14  ;;  %v1147_v54 = vsel %vm4622_vm12, %v3357_v48, %v1144_v9  ;;  %v1230_v61 = vclz %v2362_v34  ;;  %v1148_v63 = vsel %vm4622_vm12, 0, %v4590_v0 }
 0x200   : > { %v4671_v13 = vmul.u32.u64.low %v1931_v23, %v1930_v32  ;;  %v4672_v27 = vmul.u32.u64.high %v1931_v23, %v1930_v32, %v4671_v13  ;;  %2664 = vcosq.f32 %v1147_v54  ;;  %v4682_v41 = vsub.s32 32, %v4578_v22 }
 0x201   : > { %v4677_v4 = vmul.u32.u64.low %v1931_v23, %v1926_v35  ;;  %v4678_v42 = vmul.u32.u64.high %v1931_v23, %v1926_v35, %v4677_v4  ;;  %2666 = vsinq.f32 %v1147_v54  ;;  %v2363_v44 = vadd.s32 4294967294, %v1230_v61 }
 0x202   : > { %v1922_v29 = vsel %vm1916_vm0, %v1919_v52, %v1921_v20  ;;  %v1986_v26 = vand.u32 2147483647, %v3978_v25  ;;  %v4688_v56 = vshrl.u32 %v4465_v36, 5  ;;  %v4690_v46 = vand.u32 3, %v1148_v63 }
 0x203   : > { %vm2364_vm1 = vcmp.lt.s32.totalorder %v2363_v44, 0  ;;  %vm1940_vm2 = vc.u32 %v4672_v27, %v4677_v4  ;;  %v1218_v0 = vadd.s32 %v4566_v12, %v4564_v24  ;;  %v1938_v53 = vmul.u32 %v1931_v23, %v1922_v29 }
 0x204   : > { %v1233_v7 = vsel %vm2364_vm1, 0, %v2363_v44  ;;  %v1941_v8 = vadd.s32 1, %v4678_v42  ;;  %v2003_v43 = vshll.u32 %v4921_v5, %v4578_v22  ;;  %v2004_v36 = vshrl.u32 %v4919_v19, %v4682_v41 }
 0x205   : > { %v1234_v60 = vsub.s32 32, %v1233_v7  ;;  %v1238_v49 = vsub.s32 4294967266, %v1233_v7  ;;  %v1993_v57 = vand.u32 8388607, %v1986_v26  ;;  %v2006_v24 = vshll.u32 %v4919_v19, %v4578_v22 }
 0x206   : > { %v1942_v37 = vsel %vm1940_vm2, %v1941_v8, %v4678_v42  ;;  %v2007_v12 = vshrl.u32 %v4920_v17, %v4682_v41  ;;  %v1235_v50 = vshll.u32 %v4632_v33, %v1233_v7  ;;  %vm1154_vm3 = vcmp.eq.s32.totalorder %v4690_v46, 0  ;;  %v2477_v8 = vpop.f32.mrf.mxu1 }
 0x207   : > { %v1236_v3 = vshrl.u32 %v1218_v0, %v1234_v60  ;;  %v1239_v6 = vadd.s32 127, %v1238_v49  ;;  %v1943_v40 = vadd.s32 %v1942_v37, %v1938_v53  ;;  %v2010_v2 = vshrl.u32 %v4918_v16, %v4682_v41 }
 0x208   : > { %v2012_v30 = vshll.u32 %v4918_v16, %v4578_v22  ;;  %v2013_v1 = vshrl.u32 %v4922_v47, %v4682_v41  ;;  %v2015_v19 = vshll.u32 %v4922_v47, %v4578_v22  ;;  %vm1153_vm4 = vcmp.lt.s32.totalorder %v4690_v46, 2 }
 0x209   : > { %v1237_v33 = vor.u32 %v1236_v3, %v1235_v50  ;;  %v1240_v11 = vshll.u32 %v1239_v6, 23  ;;  %v1944_v58 = vadd.s32 536870912, %v1943_v40  ;;  %v2016_v18 = vshrl.u32 %v4923_v59, %v4682_v41 }
 0x20a   : > { %vm1151_vm5 = vweird.f32 %v3357_v48  ;;  %vm1164_vm6 = vcmp.lt.s32.totalorder %v4959_v51, 0  ;;  %v2005_v21 = vor.u32 %v2004_v36, %v2003_v43  ;;  %v2008_v16 = vor.u32 %v2007_v12, %v2006_v24 }
 0x20b   : > { %v2009_v55 = vshll.u32 %v4920_v17, %v4578_v22  ;;  %v2014_v28 = vor.u32 %v2013_v1, %v2012_v30  ;;  %vm1157_vm7 = vcmp.eq.s32.totalorder %v4690_v46, 2  ;;  %vm4728_vm8 = vcmp.le.f32.partialorder %v1162_v62, 0.7853982 }
 0x20c   : > { %v1241_v39 = vor.u32 4788187, %v1240_v11  ;;  %v4732_v59 = vshrl.u32 %v1944_v58, 30  ;;  %v2017_v45 = vor.u32 %v2016_v18, %v2015_v19  ;;  %v1248_v14 = vsub.s32 4, %v4615_v38 }
 0x20d   : > { %v1994_v31 = vor.u32 8388608, %v1993_v57  ;;  %v2011_v34 = vor.u32 %v2010_v2, %v2009_v55  ;;  %vm2018_vm9 = vcmp.lt.s32.totalorder %v4688_v56, 1  ;;  %v2665_v17 = vpop.eup %2664  ;;  %v1244_v35 = vcvt.s32.f32 %v1237_v33 }
 0x20e   : > { %v1242_v22 = vand.u32 2147483647, %v1241_v39  ;;  %v1946_v23 = vshll.u32 %v4732_v59, 30  ;;  %vm2021_vm10 = vcmp.lt.s32.totalorder %v4688_v56, 4  ;;  %v2667_v62 = vpop.eup %2666  ;;  %v1158_v9 = vxor.u32 2147483648, %v2665_v17 }
 0x20f   : > { %vm2020_vm11 = vcmp.lt.s32.totalorder %v4688_v56, 3  ;;  %v2026_v52 = vsel %vm2018_vm9, %v2005_v21, %v2008_v16  ;;  %v2027_v20 = vsel %vm2021_vm10, %v2014_v28, 920167782  ;;  %v1155_v32 = vxor.u32 2147483648, %v2667_v62 }
 0x210   : > { %v1245_v54 = vmul.f32 %v1244_v35, %v1242_v22  ;;  %v1947_v61 = vsub.s32 %v1943_v40, %v1946_v23  ;;  %v2031_v13 = vsel %vm2021_vm10, %v2017_v45, 1326507024  ;;  %v1159_v63 = vsel %vm1157_vm7, %v1158_v9, %v2667_v62  ;;  %v2211_v40 = vpop.f32.mrf.mxu1 }
 0x211   : > { %vm2019_vm12 = vcmp.lt.s32.totalorder %v4688_v56, 2  ;;  %v2028_v42 = vsel %vm2020_vm11, %v2011_v34, %v2027_v20  ;;  %v2030_v44 = vsel %vm2018_vm9, %v2008_v16, %v2011_v34  ;;  %v1156_v29 = vsel %vm1154_vm3, %v2665_v17, %v1155_v32 }
 0x212   : > { %v1246_v0 = vxor.u32 2147483648, %v1245_v54  ;;  %v1949_v7 = vsub.s32 0, %v1947_v61  ;;  %v2023_v53 = vsel %vm2021_vm10, %v2011_v34, 2102212464  ;;  %v1160_v60 = vsel %vm1153_vm4, %v1156_v29, %v1159_v63 }
 0x213   : > { %v2002_v49 = vshrl.u32 %v4921_v5, %v4682_v41  ;;  %v2029_v43 = vsel %vm2019_vm12, %v2026_v52, %v2028_v42  ;;  %v2032_v36 = vsel %vm2020_vm11, %v2014_v28, %v2031_v13  ;;  %v1161_v37 = vsel %vm1151_vm5, nan, %v1160_v60 }
 0x214   : > { %v1247_v57 = vsel %vm1164_vm6, %v1246_v0, %v1245_v54  ;;  %v2390_v24 = vmin.u32 %v1949_v7, %v1947_v61  ;;  %v2034_v12 = vshll.u32 %v1994_v31, 8  ;;  %2472 = vmatprep.mubr.f32.mxu0 %v1161_v37  ;;  %v2024_v41 = vsel %vm2020_vm11, %v2008_v16, %v2023_v53 }
 0x215   : > { %v1250_v46 = vsel %vm4728_vm8, %v4959_v51, %v1247_v57  ;;  %v2022_v5 = vsel %vm2018_vm9, %v2002_v49, %v2005_v21  ;;  %v2033_v48 = vsel %vm2019_vm12, %v2030_v44, %v2032_v36  ;;  %vm2250_vm13 = vcmask 15360  }
 0x216   : > { %2668 = vcosq.f32 %v1250_v46  ;;  %v1951_v50 = vclz %v2390_v24  ;;  %v4777_v3 = vmul.u32.u64.low %v2034_v12, %v2033_v48  ;;  %v4778_v6 = vmul.u32.u64.high %v2034_v12, %v2033_v48, %v4777_v3  ;;  %2260 = vst.msk [vmem:[%s4785_s13 + $0x48] sm:$0xff] %vm2250_vm13, %v2477_v8  ;;  %2259 = vst.msk [vmem:[%s4785_s13 + $0x40] sm:$0xff] %vm2250_vm13, %v2211_v40 }
 0x217   : > { %2670 = vsinq.f32 %v1250_v46  ;;  %v4787_v2 = vmul.u32.u64.low %v2034_v12, %v2029_v43  ;;  %v4788_v30 = vmul.u32.u64.high %v2034_v12, %v2029_v43, %v4787_v2  ;;  %v2025_v19 = vsel %vm2019_vm12, %v2022_v5, %v2024_v41 }
 0x218   : > { %v2391_v1 = vadd.s32 4294967294, %v1951_v50  ;;  %v1249_v33 = vsel %vm1164_vm6, %v1248_v14, %v4615_v38  ;;  %v1939_v18 = vadd.s32 %v4677_v4, %v4672_v27  ;;  %v2041_v16 = vmul.u32 %v2034_v12, %v2025_v19 }
 0x219   : > { %vm2043_vm15 = vc.u32 %v4778_v6, %v4787_v2  ;;  %v2044_v58 = vadd.s32 1, %v4788_v30  ;;  %v1251_v55 = vsel %vm4728_vm8, 0, %v1249_v33  ;;  %vm1254_vm3 = vweird.f32 %v4959_v51 }
 0x21a   : > { %vm2392_vm14 = vcmp.lt.s32.totalorder %v2391_v1, 0  ;;  %v1255_v22 = vand.u32 3, %v1251_v55  ;;  %vm1885_vm4 = vcmp.lt.s32.totalorder %v3731_v10, 0  ;;  %vm4819_vm5 = vcmp.le.f32.partialorder %v1883_v15, 0.7853982 }
 0x21b   : > { %v1954_v11 = vsel %vm2392_vm14, 0, %v2391_v1  ;;  %v2045_v28 = vsel %vm2043_vm15, %v2044_v58, %v4788_v30  ;;  %v2465_v20 = vpop.f32.mrf.mxu0  ;;  %v1969_v43 = vsub.s32 4, %v4732_v59  ;;  %v2042_v15 = vadd.s32 %v4787_v2, %v4778_v6 }
 0x21c   : > { %v1955_v56 = vsub.s32 32, %v1954_v11  ;;  %v1959_v21 = vsub.s32 4294967266, %v1954_v11  ;;  %v1956_v39 = vshll.u32 %v1947_v61, %v1954_v11  ;;  %v2046_v14 = vadd.s32 %v2045_v28, %v2041_v16  ;;  %2252 = vst.msk [vmem:[%s4785_s13 + $0x8] sm:$0xff] %vm2250_vm13, %v2465_v20 }
 0x21d   : > { %vm1260_vm0 = vcmp.eq.s32.totalorder %v1255_v22, 2  ;;  %vm1257_vm1 = vcmp.eq.s32.totalorder %v1255_v22, 0  ;;  %v2171_v63 = vpop.f32.mrf.mxu0  ;;  %vm1256_vm2 = vcmp.lt.s32.totalorder %v1255_v22, 2  ;;  %v1970_v37 = vsel %vm1885_vm4, %v1969_v43, %v4732_v59 }
 0x21e   : > { %v1957_v38 = vshrl.u32 %v1939_v18, %v1955_v56  ;;  %v1960_v45 = vadd.s32 127, %v1959_v21  ;;  %v2047_v17 = vadd.s32 536870912, %v2046_v14  ;;  %2251 = vst.msk [vmem:[%s4785_s13] sm:$0xff] %vm2250_vm13, %v2171_v63  ;;  %v1972_v46 = vsel %vm4819_vm5, 0, %v1970_v37 }
 0x21f   : > { %v1976_v40 = vand.u32 3, %v1972_v46  ;;  %vm1975_vm10 = vweird.f32 %v3731_v10  ;;  %vm1988_vm11 = vcmp.lt.s32.totalorder %v3978_v25, 0  ;;  %vm1987_vm12 = vcmp.le.f32.partialorder %v1986_v26, 0.7853982 }
 0x220   : > { %v1958_v31 = vor.u32 %v1957_v38, %v1956_v39  ;;  %v1961_v34 = vshll.u32 %v1960_v45, 23  ;;  %v4808_v23 = vshrl.u32 %v2047_v17, 30 }
 0x221   : > { %vm1981_vm7 = vcmp.eq.s32.totalorder %v1976_v40, 2  ;;  %vm1978_vm8 = vcmp.eq.s32.totalorder %v1976_v40, 0  ;;  %vm1977_vm9 = vcmp.lt.s32.totalorder %v1976_v40, 2 }
 0x222   : > { %v1962_v35 = vor.u32 4788187, %v1961_v34  ;;  %v1965_v9 = vcvt.s32.f32 %v1958_v31  ;;  %v2049_v52 = vshll.u32 %v4808_v23, 30  ;;  %v2072_v39 = vsub.s32 4, %v4808_v23 }
 0x223   : > { %v2669_v27 = vpop.eup %2668 }
 0x224   : > { %v2671_v4 = vpop.eup %2670  ;;  %v1261_v62 = vxor.u32 2147483648, %v2669_v27  ;;  %v1963_v47 = vand.u32 2147483647, %v1962_v35  ;;  %v2050_v13 = vsub.s32 %v2046_v14, %v2049_v52 }
 0x225   : > { %v1258_v32 = vxor.u32 2147483648, %v2671_v4 }
 0x226   : > { %v1262_v54 = vsel %vm1260_vm0, %v1261_v62, %v2671_v4  ;;  %v1966_v61 = vmul.f32 %v1965_v9, %v1963_v47  ;;  %v2052_v0 = vsub.s32 0, %v2050_v13 }
 0x227   : > { %v1259_v42 = vsel %vm1257_vm1, %v2669_v27, %v1258_v32  ;;  %vm2078_vm1 = vweird.f32 %v3978_v25 }
 0x228   : > { %v1263_v44 = vsel %vm1256_vm2, %v1259_v42, %v1262_v54  ;;  %v1967_v29 = vxor.u32 2147483648, %v1966_v61  ;;  %v2394_v60 = vmin.u32 %v2052_v0, %v2050_v13 }
 0x229   : > { %v1264_v7 = vsel %vm1254_vm3, nan, %v1263_v44 }
 0x22a   : > { %2473 = vmatmul.mubr.f32.gmra.mxu0 %v1264_v7  ;;  %v1968_v8 = vsel %vm1885_vm4, %v1967_v29, %v1966_v61  ;;  %v2054_v51 = vclz %v2394_v60 }
 0x22b   : > { %v1971_v49 = vsel %vm4819_vm5, %v3731_v10, %v1968_v8  ;;  %v2073_v10 = vsel %vm1988_vm11, %v2072_v39, %v4808_v23 }
 0x22c   : > { %2672 = vcosq.f32 %v1971_v49  ;;  %v2395_v36 = vadd.s32 4294967294, %v2054_v51  ;;  %v2075_v38 = vsel %vm1987_vm12, 0, %v2073_v10 }
 0x22d   : > { %2674 = vsinq.f32 %v1971_v49  ;;  %v2079_v45 = vand.u32 3, %v2075_v38 }
 0x22e   : > { %vm2396_vm6 = vcmp.lt.s32.totalorder %v2395_v36, 0 }
 0x22f   : > { %v2057_v57 = vsel %vm2396_vm6, 0, %v2395_v36  ;;  %vm2084_vm14 = vcmp.eq.s32.totalorder %v2079_v45, 2  ;;  %vm2081_vm15 = vcmp.eq.s32.totalorder %v2079_v45, 0  ;;  %vm2080_vm0 = vcmp.lt.s32.totalorder %v2079_v45, 2 }
 0x230   : > { %v2058_v24 = vsub.s32 32, %v2057_v57  ;;  %v2062_v12 = vsub.s32 4294967266, %v2057_v57  ;;  %v2059_v5 = vshll.u32 %v2050_v13, %v2057_v57 }
 0x232   : > { %v2060_v41 = vshrl.u32 %v2042_v15, %v2058_v24  ;;  %v2063_v48 = vadd.s32 127, %v2062_v12 }
 0x234   : > { %v2061_v50 = vor.u32 %v2060_v41, %v2059_v5  ;;  %v2064_v3 = vshll.u32 %v2063_v48, 23 }
 0x236   : > { %v2065_v30 = vor.u32 4788187, %v2064_v3  ;;  %v2068_v11 = vcvt.s32.f32 %v2061_v50 }
 0x238   : > { %v2066_v59 = vand.u32 2147483647, %v2065_v30 }
 0x239   : > { %v2673_v1 = vpop.eup %2672 }
 0x23a   : > { %v2675_v19 = vpop.eup %2674  ;;  %v1982_v33 = vxor.u32 2147483648, %v2673_v1  ;;  %v2069_v2 = vmul.f32 %v2068_v11, %v2066_v59 }
 0x23b   : > { %v1979_v58 = vxor.u32 2147483648, %v2675_v19 }
 0x23c   : > { %v1983_v6 = vsel %vm1981_vm7, %v1982_v33, %v2675_v19  ;;  %v2070_v21 = vxor.u32 2147483648, %v2069_v2 }
 0x23d   : > { %v1980_v18 = vsel %vm1978_vm8, %v2673_v1, %v1979_v58 }
 0x23e   : > { %v1984_v56 = vsel %vm1977_vm9, %v1980_v18, %v1983_v6  ;;  %v2071_v55 = vsel %vm1988_vm11, %v2070_v21, %v2069_v2 }
 0x23f   : > { %v1985_v16 = vsel %vm1975_vm10, nan, %v1984_v56  ;;  %v2074_v28 = vsel %vm1987_vm12, %v3978_v25, %v2071_v55 }
 0x240   : > { %2484 = vmatprep.mubr.f32.mxu1 %v1985_v16  ;;  %2676 = vcosq.f32 %v2074_v28 }
 0x241   : > { %2678 = vsinq.f32 %v2074_v28 }
 0x24a   : > { %v2480_v17 = vpop.f32.mrf.mxu1 }
 0x24b   : > { %2262 = vst.msk [vmem:[%s4785_s13 + $0x58] sm:$0xff] %vm2250_vm13, %v2480_v17 }
 0x24c   : > { %v2221_v35 = vpop.f32.mrf.mxu1 }
 0x24d   : > { %v2677_v14 = vpop.eup %2676  ;;  %2261 = vst.msk [vmem:[%s4785_s13 + $0x50] sm:$0xff] %vm2250_vm13, %v2221_v35 }
 0x24e   : > { %v2679_v31 = vpop.eup %2678  ;;  %v2085_v34 = vxor.u32 2147483648, %v2677_v14 }
 0x24f   : > { %v2082_v22 = vxor.u32 2147483648, %v2679_v31 }
 0x250   : > { %v2086_v26 = vsel %vm2084_vm14, %v2085_v34, %v2679_v31 }
 0x251   : > { %v2083_v23 = vsel %vm2081_vm15, %v2677_v14, %v2082_v22 }
 0x252   : > { %v2087_v27 = vsel %vm2080_vm0, %v2083_v23, %v2086_v26 }
 0x253   : > { %v2088_v4 = vsel %vm2078_vm1, nan, %v2087_v27 }
 0x254   : > { %2485 = vmatmul.mubr.f32.gmra.mxu1 %v2088_v4 }
 0x261   : > { %v2468_v62 = vpop.f32.mrf.mxu0 }
 0x262   : > { %2254 = vst.msk [vmem:[%s4785_s13 + $0x18] sm:$0xff] %vm2250_vm13, %v2468_v62 }
 0x263   : > { %v2181_v47 = vpop.f32.mrf.mxu0 }
 0x264   : > { %2253 = vst.msk [vmem:[%s4785_s13 + $0x10] sm:$0xff] %vm2250_vm13, %v2181_v47 }
 0x28f   : > { %v2471_v9 = vpop.f32.mrf.mxu0 }
 0x290   : > { %2256 = vst.msk [vmem:[%s4785_s13 + $0x28] sm:$0xff] %vm2250_vm13, %v2471_v9 }
 0x291   : > { %v2191_v52 = vpop.f32.mrf.mxu0 }
 0x292   : > { %2255 = vst.msk [vmem:[%s4785_s13 + $0x20] sm:$0xff] %vm2250_vm13, %v2191_v52 }
 0x2be   : > { %v2483_v25 = vpop.f32.mrf.mxu1 }
 0x2bf   : > { %2264 = vst.msk [vmem:[%s4785_s13 + $0x68] sm:$0xff] %vm2250_vm13, %v2483_v25 }
 0x2c0   : > { %v2231_v20 = vpop.f32.mrf.mxu1 }
 0x2c1   : > { %2263 = vst.msk [vmem:[%s4785_s13 + $0x60] sm:$0xff] %vm2250_vm13, %v2231_v20 }
 0x2ea   : > { %v2474_v32 = vpop.f32.mrf.mxu0 }
 0x2eb   : > { %2258 = vst.msk [vmem:[%s4785_s13 + $0x38] sm:$0xff] %vm2250_vm13, %v2474_v32 }
 0x2ec   : > { %v2201_v54 = vpop.f32.mrf.mxu0 }
 0x2ed   : > { %2257 = vst.msk [vmem:[%s4785_s13 + $0x30] sm:$0xff] %vm2250_vm13, %v2201_v54 }
 0x314   : > { %v2486_v61 = vpop.f32.mrf.mxu1 }
 0x315   : > { %2266 = vst.msk [vmem:[%s4785_s13 + $0x78] sm:$0xff] %vm2250_vm13, %v2486_v61 }
 0x316   : > { %v2241_v13 = vpop.f32.mrf.mxu1 }
 0x317   : > { %2265 = vst.msk [vmem:[%s4785_s13 + $0x70] sm:$0xff] %vm2250_vm13, %v2241_v13 }
 0x318 PF: > { %s14_s15 = sadd.s32 1, %s2687_s15  }
 0x319   : > { %p11_p4 = scmp.ge.s32.totalorder %s14_s15, 4  }
 0x31b   :  { %13 = sbr.rel (!%p11_p4) target bundleno = 1 (0x1), region = 66 }

</bundles_post_ra>
